<compile_context>
chip_gen: v7x
topology: tpu7x:2x2x1
jax: 0.10.0
libtpu: 0.0.40
codegen_flags: <defaults>
</compile_context>

<pallas_src>
import jax
import jax.numpy as jnp
from jax import lax
from jax.experimental import pallas as pl
from jax.experimental.pallas import tpu as pltpu


def lstm_kernel(x_ref, wih_ref, b_ref, whh_ref, out_ref,
                gi_ref, gf_ref, gg_ref, go_ref):
    """Whole-sequence LSTM forward in one kernel invocation.

    x_ref:   (T*B, D)  time-major, batch padded to a sublane tile, flattened
    wih_ref: (4, D, H) gate-major input weights   (PyTorch gate order i,f,g,o)
    b_ref:   (4, 1, H) gate-major fused bias (b_ih + b_hh)
    whh_ref: (4, H, H) gate-major recurrent weights
    out_ref: (B, H)    hidden state at the last timestep (lane-dense output)
    g*_ref:  (T*B, H)  VMEM scratch: hoisted per-gate input projections
    """
    B, H = out_ref.shape
    T = gi_ref.shape[0] // B

    # ---- Phase 1: hoisted input projection (no time dependence) -----------
    # One (T*B, D) @ (D, H) matmul per gate feeds the MXU with T*B rows at
    # once and removes x @ W_ih + bias from the serial critical path.
    x = x_ref[...]
    for g, dst in enumerate((gi_ref, gf_ref, gg_ref, go_ref)):
        dst[...] = (jnp.dot(x, wih_ref[g], preferred_element_type=jnp.float32)
                    + b_ref[g])

    # Recurrent weights, loaded once (gate-major: no lane slicing per step).
    w_i = whh_ref[0]
    w_f = whh_ref[1]
    w_g = whh_ref[2]
    w_o = whh_ref[3]

    # ---- Phase 2: serial recurrence over time ------------------------------
    def step(t, carry):
        h, c = carry
        r0 = pl.multiple_of(t * B, 8)          # aligned sublane-tile offset
        i_t = jax.nn.sigmoid(
            gi_ref[pl.ds(r0, B), :]
            + jnp.dot(h, w_i, preferred_element_type=jnp.float32))
        f_t = jax.nn.sigmoid(
            gf_ref[pl.ds(r0, B), :]
            + jnp.dot(h, w_f, preferred_element_type=jnp.float32))
        g_t = jnp.tanh(
            gg_ref[pl.ds(r0, B), :]
            + jnp.dot(h, w_g, preferred_element_type=jnp.float32))
        o_t = jax.nn.sigmoid(
            go_ref[pl.ds(r0, B), :]
            + jnp.dot(h, w_o, preferred_element_type=jnp.float32))
        c_new = f_t * c + i_t * g_t
        h_new = o_t * jnp.tanh(c_new)
        return h_new, c_new

    h0 = jnp.zeros((B, H), jnp.float32)
    c0 = jnp.zeros((B, H), jnp.float32)
    h_T, _ = lax.fori_loop(0, T, step, (h0, c0), unroll=True)

    out_ref[...] = h_T.astype(out_ref.dtype)


def lstm_model_forward(x, w_ih, w_hh, b_ih, b_hh, w_fc, b_fc):
    """x: (B, T, D) float32 (PyTorch batch_first convention). Returns (B, 1)."""
    B, T, D = x.shape
    H = w_hh.shape[1]
    B_pad = ((B + 7) // 8) * 8                          # full sublane tile

    # Time-major, pad batch to B_pad, flatten (T, B_pad, D) -> (T*B_pad, D).
    x_tm = jnp.transpose(x, (1, 0, 2))
    x_tm = jnp.pad(x_tm, ((0, 0), (0, B_pad - B), (0, 0)))
    x_flat = x_tm.reshape(T * B_pad, D)

    # Gate-major, pre-transposed weights (PyTorch packs rows as [i, f, g, o]).
    wih_g = jnp.transpose(w_ih.reshape(4, H, D), (0, 2, 1))   # (4, D, H)
    whh_g = jnp.transpose(w_hh.reshape(4, H, H), (0, 2, 1))   # (4, H, H)
    bias_g = (b_ih + b_hh).reshape(4, 1, H)                   # (4, 1, H)

    vmem = pl.BlockSpec(memory_space=pltpu.MemorySpace.VMEM)
    h_T = pl.pallas_call(
        lstm_kernel,
        out_shape=jax.ShapeDtypeStruct((B_pad, H), jnp.float32),
        in_specs=[vmem, vmem, vmem, vmem],
        out_specs=vmem,
        scratch_shapes=[pltpu.VMEM((T * B_pad, H), jnp.float32)
                        for _ in range(4)],
    )(x_flat, wih_g, bias_g, whh_g)

    # Final-timestep projection: (B, H) @ (H, 1) + bias is a degenerate 1-lane
    # MXU/store shape, so it is applied here in XLA on the lane-dense h_T.
    return h_T[:B] @ w_fc.T + b_fc


def lstm_model_reference(x, w_ih, w_hh, b_ih, b_hh, w_fc, b_fc):
    """Pure-JAX reference mirroring torch.nn.LSTM + Linear forward."""
    B, T, D = x.shape
    H = w_hh.shape[1]
    h = jnp.zeros((B, H), jnp.float32)
    c = jnp.zeros((B, H), jnp.float32)
    for t in range(T):
        gates = x[:, t, :] @ w_ih.T + h @ w_hh.T + b_ih + b_hh
        i_g = jax.nn.sigmoid(gates[:, 0 * H:1 * H])
        f_g = jax.nn.sigmoid(gates[:, 1 * H:2 * H])
        g_g = jnp.tanh(gates[:, 2 * H:3 * H])
        o_g = jax.nn.sigmoid(gates[:, 3 * H:4 * H])
        c = f_g * c + i_g * g_g
        h = o_g * jnp.tanh(c)
    return h @ w_fc.T + b_fc


if __name__ == "__main__":
    # Small shapes consistent with the module's forward (batch=2, seq=8,
    # input_size=4, hidden=32).
    B, T, D, H = 2, 8, 4, 32

    key = jax.random.PRNGKey(0)
    k = jax.random.split(key, 8)
    scale = 1.0 / jnp.sqrt(jnp.float32(H))   # PyTorch default uniform init range

    x = jax.random.normal(k[0], (B, T, D), dtype=jnp.float32)
    w_ih = jax.random.uniform(k[1], (4 * H, D), jnp.float32, -scale, scale)
    w_hh = jax.random.uniform(k[2], (4 * H, H), jnp.float32, -scale, scale)
    b_ih = jax.random.uniform(k[3], (4 * H,), jnp.float32, -scale, scale)
    b_hh = jax.random.uniform(k[4], (4 * H,), jnp.float32, -scale, scale)
    w_fc = jax.random.uniform(k[5], (1, H), jnp.float32, -scale, scale)
    b_fc = jax.random.uniform(k[6], (1,), jnp.float32, -scale, scale)

    out = jax.block_until_ready(
        lstm_model_forward(x, w_ih, w_hh, b_ih, b_hh, w_fc, b_fc))

    ref = lstm_model_reference(x, w_ih, w_hh, b_ih, b_hh, w_fc, b_fc)
    assert out.shape == (B, 1)
    assert jnp.allclose(out, ref, atol=1e-5, rtol=1e-4), (out, ref)

    print("KERNEL_OK")
</pallas_src>

<mosaic_0001>
module attributes {stable_mosaic.version = 11 : i64} {
  func.func @lstm_kernel(%arg0: memref<64x4xf32, #tpu.memory_space<vmem>>, %arg1: memref<4x4x32xf32, #tpu.memory_space<vmem>>, %arg2: memref<4x1x32xf32, #tpu.memory_space<vmem>>, %arg3: memref<4x32x32xf32, #tpu.memory_space<vmem>>, %arg4: memref<8x32xf32, #tpu.memory_space<vmem>>, %arg5: memref<64x32xf32, #tpu.memory_space<vmem>>, %arg6: memref<64x32xf32, #tpu.memory_space<vmem>>, %arg7: memref<64x32xf32, #tpu.memory_space<vmem>>, %arg8: memref<64x32xf32, #tpu.memory_space<vmem>>) attributes {dimension_semantics = [], scalar_prefetch = 0 : i64, scratch_operands = 4 : i64, tpu.core_type = #tpu.core_type<tc>} {
    %c0 = arith.constant 0 : index
    %c0_0 = arith.constant 0 : index
    %0 = vector.load %arg0[%c0, %c0_0] : memref<64x4xf32, #tpu.memory_space<vmem>>, vector<64x4xf32>
    %c0_1 = arith.constant 0 : index
    %c0_2 = arith.constant 0 : index
    %c0_3 = arith.constant 0 : index
    %1 = vector.load %arg1[%c0_1, %c0_2, %c0_3] : memref<4x4x32xf32, #tpu.memory_space<vmem>>, vector<1x4x32xf32>
    %2 = vector.shape_cast %1 : vector<1x4x32xf32> to vector<4x32xf32>
    %cst = arith.constant dense<0.000000e+00> : vector<64x32xf32>
    %3 = tpu.matmul %0, %2, %cst {dimension_numbers = #tpu.dot_dimension_numbers<[1], [0], [0], [1], [0, 0, 1, 1], [], []>} : vector<64x4xf32>, vector<4x32xf32>, vector<64x32xf32> -> vector<64x32xf32>
    %c0_4 = arith.constant 0 : index
    %c0_5 = arith.constant 0 : index
    %c0_6 = arith.constant 0 : index
    %4 = vector.load %arg2[%c0_4, %c0_5, %c0_6] : memref<4x1x32xf32, #tpu.memory_space<vmem>>, vector<1x1x32xf32>
    %5 = vector.shape_cast %4 : vector<1x1x32xf32> to vector<1x32xf32>
    %6 = vector.broadcast %5 : vector<1x32xf32> to vector<64x32xf32>
    %7 = arith.addf %3, %6 : vector<64x32xf32>
    %c0_7 = arith.constant 0 : index
    %c0_8 = arith.constant 0 : index
    %8 = vector.load %arg5[%c0_7, %c0_8] : memref<64x32xf32, #tpu.memory_space<vmem>>, vector<64x32xf32>
    tpu.vector_store %arg5[%c0_7, %c0_8], %7 {strides = array<i32>} : memref<64x32xf32, #tpu.memory_space<vmem>>, vector<64x32xf32>,
    %c1 = arith.constant 1 : index
    %c0_9 = arith.constant 0 : index
    %c0_10 = arith.constant 0 : index
    %9 = vector.load %arg1[%c1, %c0_9, %c0_10] : memref<4x4x32xf32, #tpu.memory_space<vmem>>, vector<1x4x32xf32>
    %10 = vector.shape_cast %9 : vector<1x4x32xf32> to vector<4x32xf32>
    %cst_11 = arith.constant dense<0.000000e+00> : vector<64x32xf32>
    %11 = tpu.matmul %0, %10, %cst_11 {dimension_numbers = #tpu.dot_dimension_numbers<[1], [0], [0], [1], [0, 0, 1, 1], [], []>} : vector<64x4xf32>, vector<4x32xf32>, vector<64x32xf32> -> vector<64x32xf32>
    %c1_12 = arith.constant 1 : index
    %c0_13 = arith.constant 0 : index
    %c0_14 = arith.constant 0 : index
    %12 = vector.load %arg2[%c1_12, %c0_13, %c0_14] : memref<4x1x32xf32, #tpu.memory_space<vmem>>, vector<1x1x32xf32>
    %13 = vector.shape_cast %12 : vector<1x1x32xf32> to vector<1x32xf32>
    %14 = vector.broadcast %13 : vector<1x32xf32> to vector<64x32xf32>
    %15 = arith.addf %11, %14 : vector<64x32xf32>
    %c0_15 = arith.constant 0 : index
    %c0_16 = arith.constant 0 : index
    %16 = vector.load %arg6[%c0_15, %c0_16] : memref<64x32xf32, #tpu.memory_space<vmem>>, vector<64x32xf32>
    tpu.vector_store %arg6[%c0_15, %c0_16], %15 {strides = array<i32>} : memref<64x32xf32, #tpu.memory_space<vmem>>, vector<64x32xf32>,
    %c2 = arith.constant 2 : index
    %c0_17 = arith.constant 0 : index
    %c0_18 = arith.constant 0 : index
    %17 = vector.load %arg1[%c2, %c0_17, %c0_18] : memref<4x4x32xf32, #tpu.memory_space<vmem>>, vector<1x4x32xf32>
    %18 = vector.shape_cast %17 : vector<1x4x32xf32> to vector<4x32xf32>
    %cst_19 = arith.constant dense<0.000000e+00> : vector<64x32xf32>
    %19 = tpu.matmul %0, %18, %cst_19 {dimension_numbers = #tpu.dot_dimension_numbers<[1], [0], [0], [1], [0, 0, 1, 1], [], []>} : vector<64x4xf32>, vector<4x32xf32>, vector<64x32xf32> -> vector<64x32xf32>
    %c2_20 = arith.constant 2 : index
    %c0_21 = arith.constant 0 : index
    %c0_22 = arith.constant 0 : index
    %20 = vector.load %arg2[%c2_20, %c0_21, %c0_22] : memref<4x1x32xf32, #tpu.memory_space<vmem>>, vector<1x1x32xf32>
    %21 = vector.shape_cast %20 : vector<1x1x32xf32> to vector<1x32xf32>
    %22 = vector.broadcast %21 : vector<1x32xf32> to vector<64x32xf32>
    %23 = arith.addf %19, %22 : vector<64x32xf32>
    %c0_23 = arith.constant 0 : index
    %c0_24 = arith.constant 0 : index
    %24 = vector.load %arg7[%c0_23, %c0_24] : memref<64x32xf32, #tpu.memory_space<vmem>>, vector<64x32xf32>
    tpu.vector_store %arg7[%c0_23, %c0_24], %23 {strides = array<i32>} : memref<64x32xf32, #tpu.memory_space<vmem>>, vector<64x32xf32>,
    %c3 = arith.constant 3 : index
    %c0_25 = arith.constant 0 : index
    %c0_26 = arith.constant 0 : index
    %25 = vector.load %arg1[%c3, %c0_25, %c0_26] : memref<4x4x32xf32, #tpu.memory_space<vmem>>, vector<1x4x32xf32>
    %26 = vector.shape_cast %25 : vector<1x4x32xf32> to vector<4x32xf32>
    %cst_27 = arith.constant dense<0.000000e+00> : vector<64x32xf32>
    %27 = tpu.matmul %0, %26, %cst_27 {dimension_numbers = #tpu.dot_dimension_numbers<[1], [0], [0], [1], [0, 0, 1, 1], [], []>} : vector<64x4xf32>, vector<4x32xf32>, vector<64x32xf32> -> vector<64x32xf32>
    %c3_28 = arith.constant 3 : index
    %c0_29 = arith.constant 0 : index
    %c0_30 = arith.constant 0 : index
    %28 = vector.load %arg2[%c3_28, %c0_29, %c0_30] : memref<4x1x32xf32, #tpu.memory_space<vmem>>, vector<1x1x32xf32>
    %29 = vector.shape_cast %28 : vector<1x1x32xf32> to vector<1x32xf32>
    %30 = vector.broadcast %29 : vector<1x32xf32> to vector<64x32xf32>
    %31 = arith.addf %27, %30 : vector<64x32xf32>
    %c0_31 = arith.constant 0 : index
    %c0_32 = arith.constant 0 : index
    %32 = vector.load %arg8[%c0_31, %c0_32] : memref<64x32xf32, #tpu.memory_space<vmem>>, vector<64x32xf32>
    tpu.vector_store %arg8[%c0_31, %c0_32], %31 {strides = array<i32>} : memref<64x32xf32, #tpu.memory_space<vmem>>, vector<64x32xf32>,
    %c0_33 = arith.constant 0 : index
    %c0_34 = arith.constant 0 : index
    %c0_35 = arith.constant 0 : index
    %33 = vector.load %arg3[%c0_33, %c0_34, %c0_35] : memref<4x32x32xf32, #tpu.memory_space<vmem>>, vector<1x32x32xf32>
    %34 = vector.shape_cast %33 : vector<1x32x32xf32> to vector<32x32xf32>
    %c1_36 = arith.constant 1 : index
    %c0_37 = arith.constant 0 : index
    %c0_38 = arith.constant 0 : index
    %35 = vector.load %arg3[%c1_36, %c0_37, %c0_38] : memref<4x32x32xf32, #tpu.memory_space<vmem>>, vector<1x32x32xf32>
    %36 = vector.shape_cast %35 : vector<1x32x32xf32> to vector<32x32xf32>
    %c2_39 = arith.constant 2 : index
    %c0_40 = arith.constant 0 : index
    %c0_41 = arith.constant 0 : index
    %37 = vector.load %arg3[%c2_39, %c0_40, %c0_41] : memref<4x32x32xf32, #tpu.memory_space<vmem>>, vector<1x32x32xf32>
    %38 = vector.shape_cast %37 : vector<1x32x32xf32> to vector<32x32xf32>
    %c3_42 = arith.constant 3 : index
    %c0_43 = arith.constant 0 : index
    %c0_44 = arith.constant 0 : index
    %39 = vector.load %arg3[%c3_42, %c0_43, %c0_44] : memref<4x32x32xf32, #tpu.memory_space<vmem>>, vector<1x32x32xf32>
    %40 = vector.shape_cast %39 : vector<1x32x32xf32> to vector<32x32xf32>
    %cst_45 = arith.constant 0.000000e+00 : f32
    %41 = vector.broadcast %cst_45 : f32 to vector<8x32xf32>
    %cst_46 = arith.constant 0.000000e+00 : f32
    %42 = vector.broadcast %cst_46 : f32 to vector<8x32xf32>
    %c0_i32 = arith.constant 0 : i32
    %c8_i32 = arith.constant 8 : i32
    %43 = arith.muli %c0_i32, %c8_i32 : i32
    %44 = tpu.assume_multiple %43, 8 : i32
    %45 = arith.index_cast %44 : i32 to index
    %c0_47 = arith.constant 0 : index
    %46 = vector.load %arg5[%45, %c0_47] : memref<64x32xf32, #tpu.memory_space<vmem>>, vector<8x32xf32>
    %cst_48 = arith.constant dense<0.000000e+00> : vector<8x32xf32>
    %47 = tpu.matmul %41, %34, %cst_48 {dimension_numbers = #tpu.dot_dimension_numbers<[1], [0], [0], [1], [0, 0, 1, 1], [], []>} : vector<8x32xf32>, vector<32x32xf32>, vector<8x32xf32> -> vector<8x32xf32>
    %48 = arith.addf %46, %47 : vector<8x32xf32>
    %49 = arith.negf %48 : vector<8x32xf32>
    %50 = math.exp %49 : vector<8x32xf32>
    %cst_49 = arith.constant 1.000000e+00 : f32
    %51 = vector.broadcast %cst_49 : f32 to vector<8x32xf32>
    %52 = arith.addf %51, %50 : vector<8x32xf32>
    %53 = arith.divf %51, %52 : vector<8x32xf32>
    %54 = arith.index_cast %44 : i32 to index
    %c0_50 = arith.constant 0 : index
    %55 = vector.load %arg6[%54, %c0_50] : memref<64x32xf32, #tpu.memory_space<vmem>>, vector<8x32xf32>
    %cst_51 = arith.constant dense<0.000000e+00> : vector<8x32xf32>
    %56 = tpu.matmul %41, %36, %cst_51 {dimension_numbers = #tpu.dot_dimension_numbers<[1], [0], [0], [1], [0, 0, 1, 1], [], []>} : vector<8x32xf32>, vector<32x32xf32>, vector<8x32xf32> -> vector<8x32xf32>
    %57 = arith.addf %55, %56 : vector<8x32xf32>
    %58 = arith.negf %57 : vector<8x32xf32>
    %59 = math.exp %58 : vector<8x32xf32>
    %cst_52 = arith.constant 1.000000e+00 : f32
    %60 = vector.broadcast %cst_52 : f32 to vector<8x32xf32>
    %61 = arith.addf %60, %59 : vector<8x32xf32>
    %62 = arith.divf %60, %61 : vector<8x32xf32>
    %63 = arith.index_cast %44 : i32 to index
    %c0_53 = arith.constant 0 : index
    %64 = vector.load %arg7[%63, %c0_53] : memref<64x32xf32, #tpu.memory_space<vmem>>, vector<8x32xf32>
    %cst_54 = arith.constant dense<0.000000e+00> : vector<8x32xf32>
    %65 = tpu.matmul %41, %38, %cst_54 {dimension_numbers = #tpu.dot_dimension_numbers<[1], [0], [0], [1], [0, 0, 1, 1], [], []>} : vector<8x32xf32>, vector<32x32xf32>, vector<8x32xf32> -> vector<8x32xf32>
    %66 = arith.addf %64, %65 : vector<8x32xf32>
    %67 = math.tanh %66 : vector<8x32xf32>
    %68 = arith.index_cast %44 : i32 to index
    %c0_55 = arith.constant 0 : index
    %69 = vector.load %arg8[%68, %c0_55] : memref<64x32xf32, #tpu.memory_space<vmem>>, vector<8x32xf32>
    %cst_56 = arith.constant dense<0.000000e+00> : vector<8x32xf32>
    %70 = tpu.matmul %41, %40, %cst_56 {dimension_numbers = #tpu.dot_dimension_numbers<[1], [0], [0], [1], [0, 0, 1, 1], [], []>} : vector<8x32xf32>, vector<32x32xf32>, vector<8x32xf32> -> vector<8x32xf32>
    %71 = arith.addf %69, %70 : vector<8x32xf32>
    %72 = arith.negf %71 : vector<8x32xf32>
    %73 = math.exp %72 : vector<8x32xf32>
    %cst_57 = arith.constant 1.000000e+00 : f32
    %74 = vector.broadcast %cst_57 : f32 to vector<8x32xf32>
    %75 = arith.addf %74, %73 : vector<8x32xf32>
    %76 = arith.divf %74, %75 : vector<8x32xf32>
    %77 = arith.mulf %62, %42 : vector<8x32xf32>
    %78 = arith.mulf %53, %67 : vector<8x32xf32>
    %79 = arith.addf %77, %78 : vector<8x32xf32>
    %80 = math.tanh %79 : vector<8x32xf32>
    %81 = arith.mulf %76, %80 : vector<8x32xf32>
    %c1_i32 = arith.constant 1 : i32
    %c8_i32_58 = arith.constant 8 : i32
    %82 = arith.muli %c1_i32, %c8_i32_58 : i32
    %83 = tpu.assume_multiple %82, 8 : i32
    %84 = arith.index_cast %83 : i32 to index
    %c0_59 = arith.constant 0 : index
    %85 = vector.load %arg5[%84, %c0_59] : memref<64x32xf32, #tpu.memory_space<vmem>>, vector<8x32xf32>
    %cst_60 = arith.constant dense<0.000000e+00> : vector<8x32xf32>
    %86 = tpu.matmul %81, %34, %cst_60 {dimension_numbers = #tpu.dot_dimension_numbers<[1], [0], [0], [1], [0, 0, 1, 1], [], []>} : vector<8x32xf32>, vector<32x32xf32>, vector<8x32xf32> -> vector<8x32xf32>
    %87 = arith.addf %85, %86 : vector<8x32xf32>
    %88 = arith.negf %87 : vector<8x32xf32>
    %89 = math.exp %88 : vector<8x32xf32>
    %cst_61 = arith.constant 1.000000e+00 : f32
    %90 = vector.broadcast %cst_61 : f32 to vector<8x32xf32>
    %91 = arith.addf %90, %89 : vector<8x32xf32>
    %92 = arith.divf %90, %91 : vector<8x32xf32>
    %93 = arith.index_cast %83 : i32 to index
    %c0_62 = arith.constant 0 : index
    %94 = vector.load %arg6[%93, %c0_62] : memref<64x32xf32, #tpu.memory_space<vmem>>, vector<8x32xf32>
    %cst_63 = arith.constant dense<0.000000e+00> : vector<8x32xf32>
    %95 = tpu.matmul %81, %36, %cst_63 {dimension_numbers = #tpu.dot_dimension_numbers<[1], [0], [0], [1], [0, 0, 1, 1], [], []>} : vector<8x32xf32>, vector<32x32xf32>, vector<8x32xf32> -> vector<8x32xf32>
    %96 = arith.addf %94, %95 : vector<8x32xf32>
    %97 = arith.negf %96 : vector<8x32xf32>
    %98 = math.exp %97 : vector<8x32xf32>
    %cst_64 = arith.constant 1.000000e+00 : f32
    %99 = vector.broadcast %cst_64 : f32 to vector<8x32xf32>
    %100 = arith.addf %99, %98 : vector<8x32xf32>
    %101 = arith.divf %99, %100 : vector<8x32xf32>
    %102 = arith.index_cast %83 : i32 to index
    %c0_65 = arith.constant 0 : index
    %103 = vector.load %arg7[%102, %c0_65] : memref<64x32xf32, #tpu.memory_space<vmem>>, vector<8x32xf32>
    %cst_66 = arith.constant dense<0.000000e+00> : vector<8x32xf32>
    %104 = tpu.matmul %81, %38, %cst_66 {dimension_numbers = #tpu.dot_dimension_numbers<[1], [0], [0], [1], [0, 0, 1, 1], [], []>} : vector<8x32xf32>, vector<32x32xf32>, vector<8x32xf32> -> vector<8x32xf32>
    %105 = arith.addf %103, %104 : vector<8x32xf32>
    %106 = math.tanh %105 : vector<8x32xf32>
    %107 = arith.index_cast %83 : i32 to index
    %c0_67 = arith.constant 0 : index
    %108 = vector.load %arg8[%107, %c0_67] : memref<64x32xf32, #tpu.memory_space<vmem>>, vector<8x32xf32>
    %cst_68 = arith.constant dense<0.000000e+00> : vector<8x32xf32>
    %109 = tpu.matmul %81, %40, %cst_68 {dimension_numbers = #tpu.dot_dimension_numbers<[1], [0], [0], [1], [0, 0, 1, 1], [], []>} : vector<8x32xf32>, vector<32x32xf32>, vector<8x32xf32> -> vector<8x32xf32>
    %110 = arith.addf %108, %109 : vector<8x32xf32>
    %111 = arith.negf %110 : vector<8x32xf32>
    %112 = math.exp %111 : vector<8x32xf32>
    %cst_69 = arith.constant 1.000000e+00 : f32
    %113 = vector.broadcast %cst_69 : f32 to vector<8x32xf32>
    %114 = arith.addf %113, %112 : vector<8x32xf32>
    %115 = arith.divf %113, %114 : vector<8x32xf32>
    %116 = arith.mulf %101, %79 : vector<8x32xf32>
    %117 = arith.mulf %92, %106 : vector<8x32xf32>
    %118 = arith.addf %116, %117 : vector<8x32xf32>
    %119 = math.tanh %118 : vector<8x32xf32>
    %120 = arith.mulf %115, %119 : vector<8x32xf32>
    %c2_i32 = arith.constant 2 : i32
    %c8_i32_70 = arith.constant 8 : i32
    %121 = arith.muli %c2_i32, %c8_i32_70 : i32
    %122 = tpu.assume_multiple %121, 8 : i32
    %123 = arith.index_cast %122 : i32 to index
    %c0_71 = arith.constant 0 : index
    %124 = vector.load %arg5[%123, %c0_71] : memref<64x32xf32, #tpu.memory_space<vmem>>, vector<8x32xf32>
    %cst_72 = arith.constant dense<0.000000e+00> : vector<8x32xf32>
    %125 = tpu.matmul %120, %34, %cst_72 {dimension_numbers = #tpu.dot_dimension_numbers<[1], [0], [0], [1], [0, 0, 1, 1], [], []>} : vector<8x32xf32>, vector<32x32xf32>, vector<8x32xf32> -> vector<8x32xf32>
    %126 = arith.addf %124, %125 : vector<8x32xf32>
    %127 = arith.negf %126 : vector<8x32xf32>
    %128 = math.exp %127 : vector<8x32xf32>
    %cst_73 = arith.constant 1.000000e+00 : f32
    %129 = vector.broadcast %cst_73 : f32 to vector<8x32xf32>
    %130 = arith.addf %129, %128 : vector<8x32xf32>
    %131 = arith.divf %129, %130 : vector<8x32xf32>
    %132 = arith.index_cast %122 : i32 to index
    %c0_74 = arith.constant 0 : index
    %133 = vector.load %arg6[%132, %c0_74] : memref<64x32xf32, #tpu.memory_space<vmem>>, vector<8x32xf32>
    %cst_75 = arith.constant dense<0.000000e+00> : vector<8x32xf32>
    %134 = tpu.matmul %120, %36, %cst_75 {dimension_numbers = #tpu.dot_dimension_numbers<[1], [0], [0], [1], [0, 0, 1, 1], [], []>} : vector<8x32xf32>, vector<32x32xf32>, vector<8x32xf32> -> vector<8x32xf32>
    %135 = arith.addf %133, %134 : vector<8x32xf32>
    %136 = arith.negf %135 : vector<8x32xf32>
    %137 = math.exp %136 : vector<8x32xf32>
    %cst_76 = arith.constant 1.000000e+00 : f32
    %138 = vector.broadcast %cst_76 : f32 to vector<8x32xf32>
    %139 = arith.addf %138, %137 : vector<8x32xf32>
    %140 = arith.divf %138, %139 : vector<8x32xf32>
    %141 = arith.index_cast %122 : i32 to index
    %c0_77 = arith.constant 0 : index
    %142 = vector.load %arg7[%141, %c0_77] : memref<64x32xf32, #tpu.memory_space<vmem>>, vector<8x32xf32>
    %cst_78 = arith.constant dense<0.000000e+00> : vector<8x32xf32>
    %143 = tpu.matmul %120, %38, %cst_78 {dimension_numbers = #tpu.dot_dimension_numbers<[1], [0], [0], [1], [0, 0, 1, 1], [], []>} : vector<8x32xf32>, vector<32x32xf32>, vector<8x32xf32> -> vector<8x32xf32>
    %144 = arith.addf %142, %143 : vector<8x32xf32>
    %145 = math.tanh %144 : vector<8x32xf32>
    %146 = arith.index_cast %122 : i32 to index
    %c0_79 = arith.constant 0 : index
    %147 = vector.load %arg8[%146, %c0_79] : memref<64x32xf32, #tpu.memory_space<vmem>>, vector<8x32xf32>
    %cst_80 = arith.constant dense<0.000000e+00> : vector<8x32xf32>
    %148 = tpu.matmul %120, %40, %cst_80 {dimension_numbers = #tpu.dot_dimension_numbers<[1], [0], [0], [1], [0, 0, 1, 1], [], []>} : vector<8x32xf32>, vector<32x32xf32>, vector<8x32xf32> -> vector<8x32xf32>
    %149 = arith.addf %147, %148 : vector<8x32xf32>
    %150 = arith.negf %149 : vector<8x32xf32>
    %151 = math.exp %150 : vector<8x32xf32>
    %cst_81 = arith.constant 1.000000e+00 : f32
    %152 = vector.broadcast %cst_81 : f32 to vector<8x32xf32>
    %153 = arith.addf %152, %151 : vector<8x32xf32>
    %154 = arith.divf %152, %153 : vector<8x32xf32>
    %155 = arith.mulf %140, %118 : vector<8x32xf32>
    %156 = arith.mulf %131, %145 : vector<8x32xf32>
    %157 = arith.addf %155, %156 : vector<8x32xf32>
    %158 = math.tanh %157 : vector<8x32xf32>
    %159 = arith.mulf %154, %158 : vector<8x32xf32>
    %c3_i32 = arith.constant 3 : i32
    %c8_i32_82 = arith.constant 8 : i32
    %160 = arith.muli %c3_i32, %c8_i32_82 : i32
    %161 = tpu.assume_multiple %160, 8 : i32
    %162 = arith.index_cast %161 : i32 to index
    %c0_83 = arith.constant 0 : index
    %163 = vector.load %arg5[%162, %c0_83] : memref<64x32xf32, #tpu.memory_space<vmem>>, vector<8x32xf32>
    %cst_84 = arith.constant dense<0.000000e+00> : vector<8x32xf32>
    %164 = tpu.matmul %159, %34, %cst_84 {dimension_numbers = #tpu.dot_dimension_numbers<[1], [0], [0], [1], [0, 0, 1, 1], [], []>} : vector<8x32xf32>, vector<32x32xf32>, vector<8x32xf32> -> vector<8x32xf32>
    %165 = arith.addf %163, %164 : vector<8x32xf32>
    %166 = arith.negf %165 : vector<8x32xf32>
    %167 = math.exp %166 : vector<8x32xf32>
    %cst_85 = arith.constant 1.000000e+00 : f32
    %168 = vector.broadcast %cst_85 : f32 to vector<8x32xf32>
    %169 = arith.addf %168, %167 : vector<8x32xf32>
    %170 = arith.divf %168, %169 : vector<8x32xf32>
    %171 = arith.index_cast %161 : i32 to index
    %c0_86 = arith.constant 0 : index
    %172 = vector.load %arg6[%171, %c0_86] : memref<64x32xf32, #tpu.memory_space<vmem>>, vector<8x32xf32>
    %cst_87 = arith.constant dense<0.000000e+00> : vector<8x32xf32>
    %173 = tpu.matmul %159, %36, %cst_87 {dimension_numbers = #tpu.dot_dimension_numbers<[1], [0], [0], [1], [0, 0, 1, 1], [], []>} : vector<8x32xf32>, vector<32x32xf32>, vector<8x32xf32> -> vector<8x32xf32>
    %174 = arith.addf %172, %173 : vector<8x32xf32>
    %175 = arith.negf %174 : vector<8x32xf32>
    %176 = math.exp %175 : vector<8x32xf32>
    %cst_88 = arith.constant 1.000000e+00 : f32
    %177 = vector.broadcast %cst_88 : f32 to vector<8x32xf32>
    %178 = arith.addf %177, %176 : vector<8x32xf32>
    %179 = arith.divf %177, %178 : vector<8x32xf32>
    %180 = arith.index_cast %161 : i32 to index
    %c0_89 = arith.constant 0 : index
    %181 = vector.load %arg7[%180, %c0_89] : memref<64x32xf32, #tpu.memory_space<vmem>>, vector<8x32xf32>
    %cst_90 = arith.constant dense<0.000000e+00> : vector<8x32xf32>
    %182 = tpu.matmul %159, %38, %cst_90 {dimension_numbers = #tpu.dot_dimension_numbers<[1], [0], [0], [1], [0, 0, 1, 1], [], []>} : vector<8x32xf32>, vector<32x32xf32>, vector<8x32xf32> -> vector<8x32xf32>
    %183 = arith.addf %181, %182 : vector<8x32xf32>
    %184 = math.tanh %183 : vector<8x32xf32>
    %185 = arith.index_cast %161 : i32 to index
    %c0_91 = arith.constant 0 : index
    %186 = vector.load %arg8[%185, %c0_91] : memref<64x32xf32, #tpu.memory_space<vmem>>, vector<8x32xf32>
    %cst_92 = arith.constant dense<0.000000e+00> : vector<8x32xf32>
    %187 = tpu.matmul %159, %40, %cst_92 {dimension_numbers = #tpu.dot_dimension_numbers<[1], [0], [0], [1], [0, 0, 1, 1], [], []>} : vector<8x32xf32>, vector<32x32xf32>, vector<8x32xf32> -> vector<8x32xf32>
    %188 = arith.addf %186, %187 : vector<8x32xf32>
    %189 = arith.negf %188 : vector<8x32xf32>
    %190 = math.exp %189 : vector<8x32xf32>
    %cst_93 = arith.constant 1.000000e+00 : f32
    %191 = vector.broadcast %cst_93 : f32 to vector<8x32xf32>
    %192 = arith.addf %191, %190 : vector<8x32xf32>
    %193 = arith.divf %191, %192 : vector<8x32xf32>
    %194 = arith.mulf %179, %157 : vector<8x32xf32>
    %195 = arith.mulf %170, %184 : vector<8x32xf32>
    %196 = arith.addf %194, %195 : vector<8x32xf32>
    %197 = math.tanh %196 : vector<8x32xf32>
    %198 = arith.mulf %193, %197 : vector<8x32xf32>
    %c4_i32 = arith.constant 4 : i32
    %c8_i32_94 = arith.constant 8 : i32
    %199 = arith.muli %c4_i32, %c8_i32_94 : i32
    %200 = tpu.assume_multiple %199, 8 : i32
    %201 = arith.index_cast %200 : i32 to index
    %c0_95 = arith.constant 0 : index
    %202 = vector.load %arg5[%201, %c0_95] : memref<64x32xf32, #tpu.memory_space<vmem>>, vector<8x32xf32>
    %cst_96 = arith.constant dense<0.000000e+00> : vector<8x32xf32>
    %203 = tpu.matmul %198, %34, %cst_96 {dimension_numbers = #tpu.dot_dimension_numbers<[1], [0], [0], [1], [0, 0, 1, 1], [], []>} : vector<8x32xf32>, vector<32x32xf32>, vector<8x32xf32> -> vector<8x32xf32>
    %204 = arith.addf %202, %203 : vector<8x32xf32>
    %205 = arith.negf %204 : vector<8x32xf32>
    %206 = math.exp %205 : vector<8x32xf32>
    %cst_97 = arith.constant 1.000000e+00 : f32
    %207 = vector.broadcast %cst_97 : f32 to vector<8x32xf32>
    %208 = arith.addf %207, %206 : vector<8x32xf32>
    %209 = arith.divf %207, %208 : vector<8x32xf32>
    %210 = arith.index_cast %200 : i32 to index
    %c0_98 = arith.constant 0 : index
    %211 = vector.load %arg6[%210, %c0_98] : memref<64x32xf32, #tpu.memory_space<vmem>>, vector<8x32xf32>
    %cst_99 = arith.constant dense<0.000000e+00> : vector<8x32xf32>
    %212 = tpu.matmul %198, %36, %cst_99 {dimension_numbers = #tpu.dot_dimension_numbers<[1], [0], [0], [1], [0, 0, 1, 1], [], []>} : vector<8x32xf32>, vector<32x32xf32>, vector<8x32xf32> -> vector<8x32xf32>
    %213 = arith.addf %211, %212 : vector<8x32xf32>
    %214 = arith.negf %213 : vector<8x32xf32>
    %215 = math.exp %214 : vector<8x32xf32>
    %cst_100 = arith.constant 1.000000e+00 : f32
    %216 = vector.broadcast %cst_100 : f32 to vector<8x32xf32>
    %217 = arith.addf %216, %215 : vector<8x32xf32>
    %218 = arith.divf %216, %217 : vector<8x32xf32>
    %219 = arith.index_cast %200 : i32 to index
    %c0_101 = arith.constant 0 : index
    %220 = vector.load %arg7[%219, %c0_101] : memref<64x32xf32, #tpu.memory_space<vmem>>, vector<8x32xf32>
    %cst_102 = arith.constant dense<0.000000e+00> : vector<8x32xf32>
    %221 = tpu.matmul %198, %38, %cst_102 {dimension_numbers = #tpu.dot_dimension_numbers<[1], [0], [0], [1], [0, 0, 1, 1], [], []>} : vector<8x32xf32>, vector<32x32xf32>, vector<8x32xf32> -> vector<8x32xf32>
    %222 = arith.addf %220, %221 : vector<8x32xf32>
    %223 = math.tanh %222 : vector<8x32xf32>
    %224 = arith.index_cast %200 : i32 to index
    %c0_103 = arith.constant 0 : index
    %225 = vector.load %arg8[%224, %c0_103] : memref<64x32xf32, #tpu.memory_space<vmem>>, vector<8x32xf32>
    %cst_104 = arith.constant dense<0.000000e+00> : vector<8x32xf32>
    %226 = tpu.matmul %198, %40, %cst_104 {dimension_numbers = #tpu.dot_dimension_numbers<[1], [0], [0], [1], [0, 0, 1, 1], [], []>} : vector<8x32xf32>, vector<32x32xf32>, vector<8x32xf32> -> vector<8x32xf32>
    %227 = arith.addf %225, %226 : vector<8x32xf32>
    %228 = arith.negf %227 : vector<8x32xf32>
    %229 = math.exp %228 : vector<8x32xf32>
    %cst_105 = arith.constant 1.000000e+00 : f32
    %230 = vector.broadcast %cst_105 : f32 to vector<8x32xf32>
    %231 = arith.addf %230, %229 : vector<8x32xf32>
    %232 = arith.divf %230, %231 : vector<8x32xf32>
    %233 = arith.mulf %218, %196 : vector<8x32xf32>
    %234 = arith.mulf %209, %223 : vector<8x32xf32>
    %235 = arith.addf %233, %234 : vector<8x32xf32>
    %236 = math.tanh %235 : vector<8x32xf32>
    %237 = arith.mulf %232, %236 : vector<8x32xf32>
    %c5_i32 = arith.constant 5 : i32
    %c8_i32_106 = arith.constant 8 : i32
    %238 = arith.muli %c5_i32, %c8_i32_106 : i32
    %239 = tpu.assume_multiple %238, 8 : i32
    %240 = arith.index_cast %239 : i32 to index
    %c0_107 = arith.constant 0 : index
    %241 = vector.load %arg5[%240, %c0_107] : memref<64x32xf32, #tpu.memory_space<vmem>>, vector<8x32xf32>
    %cst_108 = arith.constant dense<0.000000e+00> : vector<8x32xf32>
    %242 = tpu.matmul %237, %34, %cst_108 {dimension_numbers = #tpu.dot_dimension_numbers<[1], [0], [0], [1], [0, 0, 1, 1], [], []>} : vector<8x32xf32>, vector<32x32xf32>, vector<8x32xf32> -> vector<8x32xf32>
    %243 = arith.addf %241, %242 : vector<8x32xf32>
    %244 = arith.negf %243 : vector<8x32xf32>
    %245 = math.exp %244 : vector<8x32xf32>
    %cst_109 = arith.constant 1.000000e+00 : f32
    %246 = vector.broadcast %cst_109 : f32 to vector<8x32xf32>
    %247 = arith.addf %246, %245 : vector<8x32xf32>
    %248 = arith.divf %246, %247 : vector<8x32xf32>
    %249 = arith.index_cast %239 : i32 to index
    %c0_110 = arith.constant 0 : index
    %250 = vector.load %arg6[%249, %c0_110] : memref<64x32xf32, #tpu.memory_space<vmem>>, vector<8x32xf32>
    %cst_111 = arith.constant dense<0.000000e+00> : vector<8x32xf32>
    %251 = tpu.matmul %237, %36, %cst_111 {dimension_numbers = #tpu.dot_dimension_numbers<[1], [0], [0], [1], [0, 0, 1, 1], [], []>} : vector<8x32xf32>, vector<32x32xf32>, vector<8x32xf32> -> vector<8x32xf32>
    %252 = arith.addf %250, %251 : vector<8x32xf32>
    %253 = arith.negf %252 : vector<8x32xf32>
    %254 = math.exp %253 : vector<8x32xf32>
    %cst_112 = arith.constant 1.000000e+00 : f32
    %255 = vector.broadcast %cst_112 : f32 to vector<8x32xf32>
    %256 = arith.addf %255, %254 : vector<8x32xf32>
    %257 = arith.divf %255, %256 : vector<8x32xf32>
    %258 = arith.index_cast %239 : i32 to index
    %c0_113 = arith.constant 0 : index
    %259 = vector.load %arg7[%258, %c0_113] : memref<64x32xf32, #tpu.memory_space<vmem>>, vector<8x32xf32>
    %cst_114 = arith.constant dense<0.000000e+00> : vector<8x32xf32>
    %260 = tpu.matmul %237, %38, %cst_114 {dimension_numbers = #tpu.dot_dimension_numbers<[1], [0], [0], [1], [0, 0, 1, 1], [], []>} : vector<8x32xf32>, vector<32x32xf32>, vector<8x32xf32> -> vector<8x32xf32>
    %261 = arith.addf %259, %260 : vector<8x32xf32>
    %262 = math.tanh %261 : vector<8x32xf32>
    %263 = arith.index_cast %239 : i32 to index
    %c0_115 = arith.constant 0 : index
    %264 = vector.load %arg8[%263, %c0_115] : memref<64x32xf32, #tpu.memory_space<vmem>>, vector<8x32xf32>
    %cst_116 = arith.constant dense<0.000000e+00> : vector<8x32xf32>
    %265 = tpu.matmul %237, %40, %cst_116 {dimension_numbers = #tpu.dot_dimension_numbers<[1], [0], [0], [1], [0, 0, 1, 1], [], []>} : vector<8x32xf32>, vector<32x32xf32>, vector<8x32xf32> -> vector<8x32xf32>
    %266 = arith.addf %264, %265 : vector<8x32xf32>
    %267 = arith.negf %266 : vector<8x32xf32>
    %268 = math.exp %267 : vector<8x32xf32>
    %cst_117 = arith.constant 1.000000e+00 : f32
    %269 = vector.broadcast %cst_117 : f32 to vector<8x32xf32>
    %270 = arith.addf %269, %268 : vector<8x32xf32>
    %271 = arith.divf %269, %270 : vector<8x32xf32>
    %272 = arith.mulf %257, %235 : vector<8x32xf32>
    %273 = arith.mulf %248, %262 : vector<8x32xf32>
    %274 = arith.addf %272, %273 : vector<8x32xf32>
    %275 = math.tanh %274 : vector<8x32xf32>
    %276 = arith.mulf %271, %275 : vector<8x32xf32>
    %c6_i32 = arith.constant 6 : i32
    %c8_i32_118 = arith.constant 8 : i32
    %277 = arith.muli %c6_i32, %c8_i32_118 : i32
    %278 = tpu.assume_multiple %277, 8 : i32
    %279 = arith.index_cast %278 : i32 to index
    %c0_119 = arith.constant 0 : index
    %280 = vector.load %arg5[%279, %c0_119] : memref<64x32xf32, #tpu.memory_space<vmem>>, vector<8x32xf32>
    %cst_120 = arith.constant dense<0.000000e+00> : vector<8x32xf32>
    %281 = tpu.matmul %276, %34, %cst_120 {dimension_numbers = #tpu.dot_dimension_numbers<[1], [0], [0], [1], [0, 0, 1, 1], [], []>} : vector<8x32xf32>, vector<32x32xf32>, vector<8x32xf32> -> vector<8x32xf32>
    %282 = arith.addf %280, %281 : vector<8x32xf32>
    %283 = arith.negf %282 : vector<8x32xf32>
    %284 = math.exp %283 : vector<8x32xf32>
    %cst_121 = arith.constant 1.000000e+00 : f32
    %285 = vector.broadcast %cst_121 : f32 to vector<8x32xf32>
    %286 = arith.addf %285, %284 : vector<8x32xf32>
    %287 = arith.divf %285, %286 : vector<8x32xf32>
    %288 = arith.index_cast %278 : i32 to index
    %c0_122 = arith.constant 0 : index
    %289 = vector.load %arg6[%288, %c0_122] : memref<64x32xf32, #tpu.memory_space<vmem>>, vector<8x32xf32>
    %cst_123 = arith.constant dense<0.000000e+00> : vector<8x32xf32>
    %290 = tpu.matmul %276, %36, %cst_123 {dimension_numbers = #tpu.dot_dimension_numbers<[1], [0], [0], [1], [0, 0, 1, 1], [], []>} : vector<8x32xf32>, vector<32x32xf32>, vector<8x32xf32> -> vector<8x32xf32>
    %291 = arith.addf %289, %290 : vector<8x32xf32>
    %292 = arith.negf %291 : vector<8x32xf32>
    %293 = math.exp %292 : vector<8x32xf32>
    %cst_124 = arith.constant 1.000000e+00 : f32
    %294 = vector.broadcast %cst_124 : f32 to vector<8x32xf32>
    %295 = arith.addf %294, %293 : vector<8x32xf32>
    %296 = arith.divf %294, %295 : vector<8x32xf32>
    %297 = arith.index_cast %278 : i32 to index
    %c0_125 = arith.constant 0 : index
    %298 = vector.load %arg7[%297, %c0_125] : memref<64x32xf32, #tpu.memory_space<vmem>>, vector<8x32xf32>
    %cst_126 = arith.constant dense<0.000000e+00> : vector<8x32xf32>
    %299 = tpu.matmul %276, %38, %cst_126 {dimension_numbers = #tpu.dot_dimension_numbers<[1], [0], [0], [1], [0, 0, 1, 1], [], []>} : vector<8x32xf32>, vector<32x32xf32>, vector<8x32xf32> -> vector<8x32xf32>
    %300 = arith.addf %298, %299 : vector<8x32xf32>
    %301 = math.tanh %300 : vector<8x32xf32>
    %302 = arith.index_cast %278 : i32 to index
    %c0_127 = arith.constant 0 : index
    %303 = vector.load %arg8[%302, %c0_127] : memref<64x32xf32, #tpu.memory_space<vmem>>, vector<8x32xf32>
    %cst_128 = arith.constant dense<0.000000e+00> : vector<8x32xf32>
    %304 = tpu.matmul %276, %40, %cst_128 {dimension_numbers = #tpu.dot_dimension_numbers<[1], [0], [0], [1], [0, 0, 1, 1], [], []>} : vector<8x32xf32>, vector<32x32xf32>, vector<8x32xf32> -> vector<8x32xf32>
    %305 = arith.addf %303, %304 : vector<8x32xf32>
    %306 = arith.negf %305 : vector<8x32xf32>
    %307 = math.exp %306 : vector<8x32xf32>
    %cst_129 = arith.constant 1.000000e+00 : f32
    %308 = vector.broadcast %cst_129 : f32 to vector<8x32xf32>
    %309 = arith.addf %308, %307 : vector<8x32xf32>
    %310 = arith.divf %308, %309 : vector<8x32xf32>
    %311 = arith.mulf %296, %274 : vector<8x32xf32>
    %312 = arith.mulf %287, %301 : vector<8x32xf32>
    %313 = arith.addf %311, %312 : vector<8x32xf32>
    %314 = math.tanh %313 : vector<8x32xf32>
    %315 = arith.mulf %310, %314 : vector<8x32xf32>
    %c7_i32 = arith.constant 7 : i32
    %c8_i32_130 = arith.constant 8 : i32
    %316 = arith.muli %c7_i32, %c8_i32_130 : i32
    %317 = tpu.assume_multiple %316, 8 : i32
    %318 = arith.index_cast %317 : i32 to index
    %c0_131 = arith.constant 0 : index
    %319 = vector.load %arg5[%318, %c0_131] : memref<64x32xf32, #tpu.memory_space<vmem>>, vector<8x32xf32>
    %cst_132 = arith.constant dense<0.000000e+00> : vector<8x32xf32>
    %320 = tpu.matmul %315, %34, %cst_132 {dimension_numbers = #tpu.dot_dimension_numbers<[1], [0], [0], [1], [0, 0, 1, 1], [], []>} : vector<8x32xf32>, vector<32x32xf32>, vector<8x32xf32> -> vector<8x32xf32>
    %321 = arith.addf %319, %320 : vector<8x32xf32>
    %322 = arith.negf %321 : vector<8x32xf32>
    %323 = math.exp %322 : vector<8x32xf32>
    %cst_133 = arith.constant 1.000000e+00 : f32
    %324 = vector.broadcast %cst_133 : f32 to vector<8x32xf32>
    %325 = arith.addf %324, %323 : vector<8x32xf32>
    %326 = arith.divf %324, %325 : vector<8x32xf32>
    %327 = arith.index_cast %317 : i32 to index
    %c0_134 = arith.constant 0 : index
    %328 = vector.load %arg6[%327, %c0_134] : memref<64x32xf32, #tpu.memory_space<vmem>>, vector<8x32xf32>
    %cst_135 = arith.constant dense<0.000000e+00> : vector<8x32xf32>
    %329 = tpu.matmul %315, %36, %cst_135 {dimension_numbers = #tpu.dot_dimension_numbers<[1], [0], [0], [1], [0, 0, 1, 1], [], []>} : vector<8x32xf32>, vector<32x32xf32>, vector<8x32xf32> -> vector<8x32xf32>
    %330 = arith.addf %328, %329 : vector<8x32xf32>
    %331 = arith.negf %330 : vector<8x32xf32>
    %332 = math.exp %331 : vector<8x32xf32>
    %cst_136 = arith.constant 1.000000e+00 : f32
    %333 = vector.broadcast %cst_136 : f32 to vector<8x32xf32>
    %334 = arith.addf %333, %332 : vector<8x32xf32>
    %335 = arith.divf %333, %334 : vector<8x32xf32>
    %336 = arith.index_cast %317 : i32 to index
    %c0_137 = arith.constant 0 : index
    %337 = vector.load %arg7[%336, %c0_137] : memref<64x32xf32, #tpu.memory_space<vmem>>, vector<8x32xf32>
    %cst_138 = arith.constant dense<0.000000e+00> : vector<8x32xf32>
    %338 = tpu.matmul %315, %38, %cst_138 {dimension_numbers = #tpu.dot_dimension_numbers<[1], [0], [0], [1], [0, 0, 1, 1], [], []>} : vector<8x32xf32>, vector<32x32xf32>, vector<8x32xf32> -> vector<8x32xf32>
    %339 = arith.addf %337, %338 : vector<8x32xf32>
    %340 = math.tanh %339 : vector<8x32xf32>
    %341 = arith.index_cast %317 : i32 to index
    %c0_139 = arith.constant 0 : index
    %342 = vector.load %arg8[%341, %c0_139] : memref<64x32xf32, #tpu.memory_space<vmem>>, vector<8x32xf32>
    %cst_140 = arith.constant dense<0.000000e+00> : vector<8x32xf32>
    %343 = tpu.matmul %315, %40, %cst_140 {dimension_numbers = #tpu.dot_dimension_numbers<[1], [0], [0], [1], [0, 0, 1, 1], [], []>} : vector<8x32xf32>, vector<32x32xf32>, vector<8x32xf32> -> vector<8x32xf32>
    %344 = arith.addf %342, %343 : vector<8x32xf32>
    %345 = arith.negf %344 : vector<8x32xf32>
    %346 = math.exp %345 : vector<8x32xf32>
    %cst_141 = arith.constant 1.000000e+00 : f32
    %347 = vector.broadcast %cst_141 : f32 to vector<8x32xf32>
    %348 = arith.addf %347, %346 : vector<8x32xf32>
    %349 = arith.divf %347, %348 : vector<8x32xf32>
    %350 = arith.mulf %335, %313 : vector<8x32xf32>
    %351 = arith.mulf %326, %340 : vector<8x32xf32>
    %352 = arith.addf %350, %351 : vector<8x32xf32>
    %353 = math.tanh %352 : vector<8x32xf32>
    %354 = arith.mulf %349, %353 : vector<8x32xf32>
    %c8_i32_142 = arith.constant 8 : i32
    %c0_143 = arith.constant 0 : index
    %c0_144 = arith.constant 0 : index
    %355 = vector.load %arg4[%c0_143, %c0_144] : memref<8x32xf32, #tpu.memory_space<vmem>>, vector<8x32xf32>
    tpu.vector_store %arg4[%c0_143, %c0_144], %354 {strides = array<i32>} : memref<8x32xf32, #tpu.memory_space<vmem>>, vector<8x32xf32>,
    return
  }
}

</mosaic_0001>

<bundles_post_ra>
// kernel: tpu_custom_call.1
= control target key start
LH: loop header
LB: loop body
LE: loop exit
PB: predicated region body
PF: predicated region fallthrough
CT: control target
= control target key end

     0   :  { %9 = vsyncpa [#allocation7], 0  ;;  %s4670_s0 = inlined_call_operand.vmem [shape: f32[64,4], index: 0, kind: input, shape index: {}]   ;;  %s4671_s1 = inlined_call_operand.vmem [shape: f32[4,4,32], index: 1, kind: input, shape index: {}]   ;;  %s4672_s2 = inlined_call_operand.vmem [shape: f32[4,1,32], index: 2, kind: input, shape index: {}]   ;;  %s4673_s3 = inlined_call_operand.hbm [shape: f32[4,32,32], index: 3, kind: input, shape index: {}]   ;;  %s4674_s4 = inlined_call_operand.hbm [shape: f32[8,32], index: 4, kind: output, shape index: {}]  }
   0x1   :  { %10 = vsyncpa [#allocation8], 0  ;;  %s4229_s15 = smov [#allocation6]   ;;  %s4181_s19 = scalar_lea.hbm %s4673_s3, 2048 }
   0x2   :  { %s22_s16 = sshll.u32 %s4229_s15, 4  ;;  %p4182_p0 = scmp.ne.s32.totalorder %s4673_s3, %s4181_s19  ;;  %s23_s16 = int_to_ptr.vmem [resolvable:$true] %s22_s16 }
   0x3   :  { %p4185_p1 = scmp.lt.u32.totalorder %s4181_s19, %s4673_s3 }
   0x5   :  { %p4187_p2 = pnand %p4185_p1, %p4182_p0 }
   0x7   :  { %4190 = shalt.err (!%p4187_p2)
}
   0x8   :  { %s4191_s24 = scalar_lea.vmem %s23_s16, 2048  ;;  %p4196_p4 = scmp.lt.s32.totalorder %s23_s16, %s23_s16 }
   0x9   :  { %p4192_p3 = scmp.ne.s32.totalorder %s23_s16, %s4191_s24  ;;  %p4197_p5 = scmp.lt.s32.totalorder %s4191_s24, %s4191_s24 }
   0xb   :  { %p4198_p6 = por %p4197_p5, %p4196_p4 }
   0xd   :  { %p4199_p7 = pnand %p4198_p6, %p4192_p3 }
   0xf   :  { %4202 = shalt.err (!%p4199_p7)
}
  0x10   :  { %s4230_s25 = smov 128   ;;  %s4231_s26 = smov 8  }
  0x11   :  { %28 = dma.hbm_to_vmem [thread:$0]  %s4673_s3, 2048, %s23_s16, [#allocation7], %s4230_s25, %s4230_s25, %s4231_s26  }
  0x12   :  { %4225 = dma.done.wait [#allocation7], 2048  }
  0x13   :  { %4226 = vsyncadd [#allocation7], 4294965248  ;;  %vm73_vm0 = vcmask 1043456   ;;  %vm48_vm1 = vcmask 31744   ;;  %v40_v0 = vld [vmem:[%s4671_s1] sm:$0xf] }
  0x14   :  { %v3162_v1 = vld [vmem:[%s4671_s1 + $0x4] sm:$0xf]  ;;  %3446 = vmatprep.subr.msk.mxu0 %vm73_vm0, %v40_v0  ;;  %v33_v3 = vld [vmem:[%s4670_s0 + $0x8] sm:$0xff]  ;;  %v34_v6 = vld [vmem:[%s4670_s0 + $0x10] sm:$0xff]  ;;  %v4232_v11 = vmov 0.0|0.0   ;;  %vm4233_vm2 = vmmov 0  }
  0x15   :  { %v32_v2 = vld [vmem:[%s4670_s0] sm:$0xff]  ;;  %3460 = vmatprep.subr.msk.mxu1 %vm73_vm0, %v3162_v1  ;;  %3447 = vmatpush3.msk.msra.mxu0 %vm73_vm0, %v40_v0  ;;  %v3174_v4 = vld [vmem:[%s4671_s1 + $0x8] sm:$0xf]  ;;  %v3186_v5 = vld [vmem:[%s4671_s1 + $0xc] sm:$0xf]  ;;  %v4234_v29 = vmov 0.0  }
  0x16   :  { %3448 = vmatprep.mubr.msk.f32.mxu0 %vm48_vm1, %v32_v2  ;;  %3461 = vmatpush3.msk.msra.mxu1 %vm73_vm0, %v3162_v1  ;;  %v35_v7 = vld [vmem:[%s4670_s0 + $0x18] sm:$0xff]  ;;  %v36_v8 = vld [vmem:[%s4670_s0 + $0x20] sm:$0xff]  ;;  %v37_v9 = vld [vmem:[%s4670_s0 + $0x28] sm:$0xff]  ;;  %vm182_vm3 = vcmask 261120  }
  0x17   :  { %3462 = vmatprep.mubr.msk.f32.mxu1 %vm48_vm1, %v32_v2  ;;  %3449 = vmatmul.mubr.msk.f32.vlgmr.msra.gmra.mrb[0].mxu0 %vm48_vm1, %v33_v3  ;;  %v38_v10 = vld [vmem:[%s4670_s0 + $0x30] sm:$0xff]  ;;  %v39_v12 = vld [vmem:[%s4670_s0 + $0x38] sm:$0xff]  ;;  %v570_v14 = vld [vmem:[#allocation6 + $0x8] sm:$0xff] }
  0x18   :  { %3463 = vmatmul.mubr.msk.f32.vlgmr.msra.gmra.mrb[0].mxu1 %vm48_vm1, %v33_v3  ;;  %3474 = vmatprep.subr.msk.mxu0 %vm73_vm0, %v3174_v4  ;;  %v569_v13 = vld [vmem:[#allocation6] sm:$0xff]  ;;  %v575_v16 = vld [vmem:[#allocation6 + $0x28] sm:$0xff]  ;;  %v571_v19 = vld [vmem:[#allocation6 + $0x10] sm:$0xff] }
  0x19   :  { %3488 = vmatprep.subr.msk.mxu1 %vm73_vm0, %v3186_v5  ;;  %3475 = vmatpush3.msk.msra.mxu0 %vm73_vm0, %v3174_v4  ;;  %v574_v15 = vld [vmem:[#allocation6 + $0x20] sm:$0xff]  ;;  %v4337_v17 = vpack.c.bf16 %v570_v14, %v569_v13  ;;  %v572_v20 = vld [vmem:[#allocation6 + $0x18] sm:$0xff]  ;;  %v576_v21 = vld [vmem:[#allocation6 + $0x30] sm:$0xff] }
  0x1a   :  { %3489 = vmatpush3.msk.msra.mxu1 %vm73_vm0, %v3186_v5  ;;  %3451 = vmatprep.mubr.msk.f32.mxu0 %vm48_vm1, %v34_v6  ;;  %v4339_v18 = vpack.c.bf16 %v575_v16, %v574_v15  ;;  %v577_v22 = vld [vmem:[#allocation6 + $0x38] sm:$0xff]  ;;  %v4347_v23 = vpack.c.bf16 %v572_v20, %v571_v19  ;;  %v579_v25 = vld [vmem:[#allocation6 + $0x40] sm:$0xff]  ;;  %v580_v26 = vld [vmem:[#allocation6 + $0x48] sm:$0xff] }
  0x1b   :  { %3465 = vmatprep.mubr.msk.f32.mxu1 %vm48_vm1, %v34_v6  ;;  %3452 = vmatmul.mubr.msk.f32.gmra.mrb[2].mxu0 %vm48_vm1, %v35_v7  ;;  %v4349_v24 = vpack.c.bf16 %v577_v22, %v576_v21  ;;  %v584_v27 = vld [vmem:[#allocation6 + $0x60] sm:$0xff]  ;;  %v585_v28 = vld [vmem:[#allocation6 + $0x68] sm:$0xff]  ;;  %v4371_v30 = vpack.c.bf16 %v580_v26, %v579_v25  ;;  %v581_v32 = vld [vmem:[#allocation6 + $0x50] sm:$0xff] }
  0x1c   :  { %3466 = vmatmul.mubr.msk.f32.gmra.mrb[2].mxu1 %vm48_vm1, %v35_v7  ;;  %3454 = vmatprep.mubr.msk.f32.mxu0 %vm48_vm1, %v36_v8  ;;  %v4373_v31 = vpack.c.bf16 %v585_v28, %v584_v27  ;;  %v582_v33 = vld [vmem:[#allocation6 + $0x58] sm:$0xff]  ;;  %v586_v34 = vld [vmem:[#allocation6 + $0x70] sm:$0xff]  ;;  %v3152_v38 = vld [vmem:[%s4672_s2] ss:$0 sm:$0xff] }
  0x1d   :  { %3468 = vmatprep.mubr.msk.f32.mxu1 %vm48_vm1, %v36_v8  ;;  %3854 = vmatprep.subr.bf16.mxu0 %v4232_v11  ;;  %v587_v35 = vld [vmem:[#allocation6 + $0x78] sm:$0xff]  ;;  %v4379_v36 = vpack.c.bf16 %v582_v33, %v581_v32  ;;  %v3164_v39 = vld [vmem:[%s4672_s2 + $0x1] ss:$0 sm:$0xff] }
  0x1e   :  { %3860 = vmatprep.subr.bf16.mxu1 %v4232_v11  ;;  %v4381_v37 = vpack.c.bf16 %v587_v35, %v586_v34 }
  0x1f   :  { %3455 = vmatmul.mubr.msk.f32.gmra.mrb[4].mxu0 %vm48_vm1, %v37_v9 }
  0x20   :  { %3469 = vmatmul.mubr.msk.f32.gmra.mrb[4].mxu1 %vm48_vm1, %v37_v9  ;;  %3457 = vmatprep.mubr.msk.f32.mxu0 %vm48_vm1, %v38_v10 }
  0x21   :  { %3471 = vmatprep.mubr.msk.f32.mxu1 %vm48_vm1, %v38_v10 }
  0x23   :  { %3458 = vmatmul.mubr.msk.f32.gmra.mrb[6].mxu0 %vm48_vm1, %v39_v12 }
  0x24   :  { %3472 = vmatmul.mubr.msk.f32.gmra.mrb[6].mxu1 %vm48_vm1, %v39_v12  ;;  %3476 = vmatprep.mubr.msk.f32.mxu0 %vm48_vm1, %v32_v2 }
  0x25   :  { %3490 = vmatprep.mubr.msk.f32.mxu1 %vm48_vm1, %v32_v2 }
  0x27   :  { %3477 = vmatmul.mubr.msk.f32.vlgmr.msra.gmra.mrb[8].mxu0 %vm48_vm1, %v33_v3 }
  0x28   :  { %3491 = vmatmul.mubr.msk.f32.vlgmr.msra.gmra.mrb[8].mxu1 %vm48_vm1, %v33_v3  ;;  %3856 = vmatpush3.bf16.msra.mxu0 %v4337_v17 }
  0x29   :  { %3862 = vmatpush3.bf16.msra.mxu1 %v4339_v18  ;;  %3479 = vmatprep.mubr.msk.f32.mxu0 %vm48_vm1, %v34_v6 }
  0x2a   :  { %3493 = vmatprep.mubr.msk.f32.mxu1 %vm48_vm1, %v34_v6  ;;  %3857 = vmatprep.subr.bf16.mxu0 %v4232_v11 }
  0x2b   :  { %3863 = vmatprep.subr.bf16.mxu1 %v4232_v11  ;;  %3480 = vmatmul.mubr.msk.f32.gmra.mrb[10].mxu0 %vm48_vm1, %v35_v7 }
  0x2c   :  { %3494 = vmatmul.mubr.msk.f32.gmra.mrb[10].mxu1 %vm48_vm1, %v35_v7  ;;  %3482 = vmatprep.mubr.msk.f32.mxu0 %vm48_vm1, %v36_v8 }
  0x2d   :  { %3496 = vmatprep.mubr.msk.f32.mxu1 %vm48_vm1, %v36_v8  ;;  %3859 = vmatpush3.bf16.msra.mxu0 %v4347_v23  ;;  %v3176_v8 = vld [vmem:[%s4672_s2 + $0x2] ss:$0 sm:$0xff] }
  0x2e   :  { %3865 = vmatpush3.bf16.msra.mxu1 %v4349_v24  ;;  %3866 = vmatprep.subr.bf16.mxu0 %v4232_v11 }
  0x2f   :  { %3872 = vmatprep.subr.bf16.mxu1 %v4232_v11  ;;  %3483 = vmatmul.mubr.msk.f32.gmra.mrb[12].mxu0 %vm48_vm1, %v37_v9 }
  0x30   :  { %3497 = vmatmul.mubr.msk.f32.gmra.mrb[12].mxu1 %vm48_vm1, %v37_v9  ;;  %3485 = vmatprep.mubr.msk.f32.mxu0 %vm48_vm1, %v38_v10  ;;  %v3188_v9 = vld [vmem:[%s4672_s2 + $0x3] ss:$0 sm:$0xff]  ;;  %s4235_s2 = smov [#allocation9]  }
  0x31   :  { %3499 = vmatprep.mubr.msk.f32.mxu1 %vm48_vm1, %v38_v10  ;;  %s3143_s6 = sshll.u32 %s4235_s2, 4  ;;  %s3144_s6 = int_to_ptr.vmem [resolvable:$true] %s3143_s6 }
  0x32   :  { %s4203_s7 = scalar_lea.vmem %s3144_s6, 128  ;;  %p4208_p9 = scmp.lt.s32.totalorder %s3144_s6, %s3144_s6 }
  0x33   :  { %3486 = vmatmul.mubr.msk.f32.gmra.mrb[14].mxu0 %vm48_vm1, %v39_v12  ;;  %p4204_p8 = scmp.ne.s32.totalorder %s3144_s6, %s4203_s7  ;;  %p4209_p10 = scmp.lt.s32.totalorder %s4203_s7, %s4203_s7 }
  0x34   :  { %3500 = vmatmul.mubr.msk.f32.gmra.mrb[14].mxu1 %vm48_vm1, %v39_v12  ;;  %3510 = vmatprep.mubr.msk.f32.mxu0 %vm4233_vm2, %v4234_v29 }
  0x35   :  { %3521 = vmatprep.mubr.msk.f32.mxu1 %vm4233_vm2, %v4234_v29  ;;  %p4210_p11 = por %p4209_p10, %p4208_p9 }
  0x37   :  { %3511 = vmatmul.mubr.f32.vlgmr.msra.gmra.mrb[16].mxu0 %v4234_v29  ;;  %p4211_p12 = pnand %p4210_p11, %p4204_p8 }
  0x38   :  { %3522 = vmatmul.mubr.f32.vlgmr.msra.gmra.mrb[16].mxu1 %v4234_v29  ;;  %3868 = vmatpush3.bf16.msra.mxu0 %v4371_v30 }
  0x39   :  { %3874 = vmatpush3.bf16.msra.mxu1 %v4373_v31  ;;  %3869 = vmatprep.subr.bf16.mxu0 %v4232_v11 }
  0x3a   :  { %3875 = vmatprep.subr.bf16.mxu1 %v4232_v11  ;;  %3532 = vmatprep.mubr.msk.f32.mxu0 %vm4233_vm2, %v4234_v29 }
  0x3b   :  { %3543 = vmatprep.mubr.msk.f32.mxu1 %vm4233_vm2, %v4234_v29 }
  0x3c   :  { %3871 = vmatpush3.bf16.msra.mxu0 %v4379_v36 }
  0x3d   :  { %3877 = vmatpush3.bf16.msra.mxu1 %v4381_v37  ;;  %3878 = vmatprep.subr.bf16.mxu0 %v4232_v11 }
  0x3e   :  { %3884 = vmatprep.subr.bf16.mxu1 %v4232_v11 }
  0x3f   :  { %3533 = vmatmul.mubr.f32.vlgmr.msra.gmra.mrb[18].mxu0 %v4234_v29 }
  0x40   :  { %3544 = vmatmul.mubr.f32.vlgmr.msra.gmra.mrb[18].mxu1 %v4234_v29  ;;  %3880 = vmatpush3.bf16.msra.mxu0 %v4337_v17 }
  0x41   :  { %3886 = vmatpush3.bf16.msra.mxu1 %v4339_v18  ;;  %3881 = vmatprep.subr.bf16.mxu0 %v4232_v11 }
  0x42   :  { %3887 = vmatprep.subr.bf16.mxu1 %v4232_v11  ;;  %3554 = vmatprep.mubr.msk.f32.mxu0 %vm4233_vm2, %v4234_v29 }
  0x43   :  { %3565 = vmatprep.mubr.msk.f32.mxu1 %vm4233_vm2, %v4234_v29 }
  0x44   :  { %3883 = vmatpush3.bf16.msra.mxu0 %v4347_v23 }
  0x45   :  { %3889 = vmatpush3.bf16.msra.mxu1 %v4349_v24  ;;  %3890 = vmatprep.subr.bf16.mxu0 %v4232_v11 }
  0x46   :  { %3896 = vmatprep.subr.bf16.mxu1 %v4232_v11 }
  0xea   :  { %v3450_v40 = vpop.f32.mrb[0].mxu0 }
  0xeb   :  { %v3464_v41 = vpop.f32.mrb[0].mxu1  ;;  %v149_v42 = vadd.f32 %v3450_v40, %v3152_v38  ;;  %v143_v44 = vpop.f32.mrb[1].mxu0 }
  0xec   :  { %v276_v43 = vadd.f32 %v3464_v41, %v3164_v39  ;;  %v270_v45 = vpop.f32.mrb[1].mxu1  ;;  %v144_v46 = vadd.f32 %v3152_v38, %v143_v44 }
  0xed   :  { %v271_v47 = vadd.f32 %v3164_v39, %v270_v45  ;;  %184 = vst.msk [vmem:[#allocation2 + $0x8] sm:$0xff] %vm182_vm3, %v149_v42 }
  0xee   :  { %310 = vst.msk [vmem:[#allocation3 + $0x8] sm:$0xff] %vm182_vm3, %v276_v43  ;;  %183 = vst.msk [vmem:[#allocation2] sm:$0xff] %vm182_vm3, %v144_v46  ;;  %v3453_v48 = vpop.f32.mrb[2].mxu0 }
  0xef   :  { %309 = vst.msk [vmem:[#allocation3] sm:$0xff] %vm182_vm3, %v271_v47  ;;  %v3467_v49 = vpop.f32.mrb[2].mxu1  ;;  %v159_v50 = vadd.f32 %v3453_v48, %v3152_v38  ;;  %v153_v52 = vpop.f32.mrb[3].mxu0 }
  0xf0   :  { %v286_v51 = vadd.f32 %v3467_v49, %v3164_v39  ;;  %v280_v53 = vpop.f32.mrb[3].mxu1  ;;  %v154_v54 = vadd.f32 %v3152_v38, %v153_v52 }
  0xf1   :  { %v281_v55 = vadd.f32 %v3164_v39, %v280_v53  ;;  %186 = vst.msk [vmem:[#allocation2 + $0x18] sm:$0xff] %vm182_vm3, %v159_v50 }
  0xf2   :  { %312 = vst.msk [vmem:[#allocation3 + $0x18] sm:$0xff] %vm182_vm3, %v286_v51  ;;  %185 = vst.msk [vmem:[#allocation2 + $0x10] sm:$0xff] %vm182_vm3, %v154_v54  ;;  %v3456_v56 = vpop.f32.mrb[4].mxu0 }
  0xf3   :  { %311 = vst.msk [vmem:[#allocation3 + $0x10] sm:$0xff] %vm182_vm3, %v281_v55  ;;  %v3470_v57 = vpop.f32.mrb[4].mxu1  ;;  %v169_v58 = vadd.f32 %v3456_v56, %v3152_v38  ;;  %v163_v60 = vpop.f32.mrb[5].mxu0 }
  0xf4   :  { %v296_v59 = vadd.f32 %v3470_v57, %v3164_v39  ;;  %v290_v61 = vpop.f32.mrb[5].mxu1  ;;  %v164_v62 = vadd.f32 %v3152_v38, %v163_v60 }
  0xf5   :  { %v291_v63 = vadd.f32 %v3164_v39, %v290_v61  ;;  %188 = vst.msk [vmem:[#allocation2 + $0x28] sm:$0xff] %vm182_vm3, %v169_v58  ;;  %v588_v52 = vld [vmem:[#allocation2] sm:$0xff] }
  0xf6   :  { %314 = vst.msk [vmem:[#allocation3 + $0x28] sm:$0xff] %vm182_vm3, %v296_v59  ;;  %187 = vst.msk [vmem:[#allocation2 + $0x20] sm:$0xff] %vm182_vm3, %v164_v62  ;;  %v3459_v0 = vpop.f32.mrb[6].mxu0  ;;  %v669_v54 = vld [vmem:[#allocation3] sm:$0xff] }
  0xf7   :  { %313 = vst.msk [vmem:[#allocation3 + $0x20] sm:$0xff] %vm182_vm3, %v291_v63  ;;  %v3473_v1 = vpop.f32.mrb[6].mxu1  ;;  %v179_v2 = vadd.f32 %v3459_v0, %v3152_v38  ;;  %v173_v4 = vpop.f32.mrb[7].mxu0 }
  0xf8   :  { %v306_v3 = vadd.f32 %v3473_v1, %v3164_v39  ;;  %v300_v5 = vpop.f32.mrb[7].mxu1  ;;  %v174_v6 = vadd.f32 %v3152_v38, %v173_v4 }
  0xf9   :  { %v301_v7 = vadd.f32 %v3164_v39, %v300_v5  ;;  %190 = vst.msk [vmem:[#allocation2 + $0x38] sm:$0xff] %vm182_vm3, %v179_v2 }
  0xfa   :  { %316 = vst.msk [vmem:[#allocation3 + $0x38] sm:$0xff] %vm182_vm3, %v306_v3  ;;  %189 = vst.msk [vmem:[#allocation2 + $0x30] sm:$0xff] %vm182_vm3, %v174_v6  ;;  %v3478_v10 = vpop.f32.mrb[8].mxu0 }
  0xfb   :  { %315 = vst.msk [vmem:[#allocation3 + $0x30] sm:$0xff] %vm182_vm3, %v301_v7  ;;  %v3492_v12 = vpop.f32.mrb[8].mxu1  ;;  %v402_v13 = vadd.f32 %v3478_v10, %v3176_v8  ;;  %v396_v15 = vpop.f32.mrb[9].mxu0 }
  0xfc   :  { %v528_v14 = vadd.f32 %v3492_v12, %v3188_v9  ;;  %v522_v16 = vpop.f32.mrb[9].mxu1  ;;  %v397_v19 = vadd.f32 %v3176_v8, %v396_v15 }
  0xfd   :  { %v523_v20 = vadd.f32 %v3188_v9, %v522_v16  ;;  %436 = vst.msk [vmem:[#allocation4 + $0x8] sm:$0xff] %vm182_vm3, %v402_v13 }
  0xfe   :  { %562 = vst.msk [vmem:[#allocation5 + $0x8] sm:$0xff] %vm182_vm3, %v528_v14  ;;  %435 = vst.msk [vmem:[#allocation4] sm:$0xff] %vm182_vm3, %v397_v19  ;;  %v3481_v21 = vpop.f32.mrb[10].mxu0 }
  0xff   :  { %561 = vst.msk [vmem:[#allocation5] sm:$0xff] %vm182_vm3, %v523_v20  ;;  %v3495_v22 = vpop.f32.mrb[10].mxu1  ;;  %v412_v25 = vadd.f32 %v3481_v21, %v3176_v8  ;;  %v406_v27 = vpop.f32.mrb[11].mxu0 }
 0x100   :  { %v538_v26 = vadd.f32 %v3495_v22, %v3188_v9  ;;  %v532_v28 = vpop.f32.mrb[11].mxu1  ;;  %v407_v32 = vadd.f32 %v3176_v8, %v406_v27  ;;  %v904_v27 = vld [vmem:[#allocation2 + $0x8] sm:$0xff] }
 0x101   :  { %v533_v33 = vadd.f32 %v3188_v9, %v532_v28  ;;  %438 = vst.msk [vmem:[#allocation4 + $0x18] sm:$0xff] %vm182_vm3, %v412_v25 }
 0x102   :  { %564 = vst.msk [vmem:[#allocation5 + $0x18] sm:$0xff] %vm182_vm3, %v538_v26  ;;  %437 = vst.msk [vmem:[#allocation4 + $0x10] sm:$0xff] %vm182_vm3, %v407_v32  ;;  %v3484_v34 = vpop.f32.mrb[12].mxu0  ;;  %v986_v32 = vld [vmem:[#allocation3 + $0x8] sm:$0xff] }
 0x103   :  { %563 = vst.msk [vmem:[#allocation5 + $0x10] sm:$0xff] %vm182_vm3, %v533_v33  ;;  %v3498_v35 = vpop.f32.mrb[12].mxu1  ;;  %v422_v38 = vadd.f32 %v3484_v34, %v3176_v8  ;;  %v416_v40 = vpop.f32.mrb[13].mxu0 }
 0x104   :  { %v548_v39 = vadd.f32 %v3498_v35, %v3188_v9  ;;  %v542_v41 = vpop.f32.mrb[13].mxu1  ;;  %v417_v42 = vadd.f32 %v3176_v8, %v416_v40 }
 0x105   :  { %v543_v43 = vadd.f32 %v3188_v9, %v542_v41  ;;  %440 = vst.msk [vmem:[#allocation4 + $0x28] sm:$0xff] %vm182_vm3, %v422_v38  ;;  %v747_v4 = vld [vmem:[#allocation4] sm:$0xff] }
 0x106   :  { %566 = vst.msk [vmem:[#allocation5 + $0x28] sm:$0xff] %vm182_vm3, %v548_v39  ;;  %439 = vst.msk [vmem:[#allocation4 + $0x20] sm:$0xff] %vm182_vm3, %v417_v42  ;;  %v3487_v44 = vpop.f32.mrb[14].mxu0  ;;  %v820_v63 = vld [vmem:[#allocation5] sm:$0xff] }
 0x107   :  { %565 = vst.msk [vmem:[#allocation5 + $0x20] sm:$0xff] %vm182_vm3, %v543_v43  ;;  %v3501_v45 = vpop.f32.mrb[14].mxu1  ;;  %v432_v46 = vadd.f32 %v3487_v44, %v3176_v8  ;;  %v426_v48 = vpop.f32.mrb[15].mxu0  ;;  %v1139_v43 = vld [vmem:[#allocation5 + $0x8] sm:$0xff] }
 0x108   :  { %v558_v47 = vadd.f32 %v3501_v45, %v3188_v9  ;;  %v552_v49 = vpop.f32.mrb[15].mxu1  ;;  %v427_v50 = vadd.f32 %v3176_v8, %v426_v48  ;;  %v1065_v48 = vld [vmem:[#allocation4 + $0x8] sm:$0xff] }
 0x109   :  { %v553_v51 = vadd.f32 %v3188_v9, %v552_v49  ;;  %442 = vst.msk [vmem:[#allocation4 + $0x38] sm:$0xff] %vm182_vm3, %v432_v46 }
 0x10a   :  { %568 = vst.msk [vmem:[#allocation5 + $0x38] sm:$0xff] %vm182_vm3, %v558_v47  ;;  %441 = vst.msk [vmem:[#allocation4 + $0x30] sm:$0xff] %vm182_vm3, %v427_v50  ;;  %v658_v53 = vpop.f32.mrb[16].mxu0 }
 0x10b   :  { %567 = vst.msk [vmem:[#allocation5 + $0x30] sm:$0xff] %vm182_vm3, %v553_v51  ;;  %v736_v55 = vpop.f32.mrb[16].mxu1  ;;  %v662_v56 = vadd.f32 %v658_v53, %v588_v52  ;;  %v3512_v58 = vpop.f32.mrb[17].mxu0 }
 0x10c   :  { %v740_v57 = vadd.f32 %v736_v55, %v669_v54  ;;  %v3523_v59 = vpop.f32.mrb[17].mxu1 }
 0x10d   :  { %v3198_v60 = vmul.f32 -1.442695, %v662_v56 }
 0x10e   :  { %v3199_v61 = vmul.f32 -1.442695, %v740_v57 }
 0x10f   :  { %4053 = vpow2.f32 %v3198_v60 }
 0x110   :  { %4055 = vpow2.f32 %v3199_v61 }
 0x112   :  { %v814_v62 = vpop.f32.mrb[18].mxu0 }
 0x113   :  { %v887_v0 = vpop.f32.mrb[18].mxu1  ;;  %v3534_v2 = vpop.f32.mrb[19].mxu0  ;;  %v818_v6 = vadd.f32 %v814_v62, %v747_v4  ;;  %v1305_v4 = vld [vmem:[#allocation3 + $0x10] sm:$0xff] }
 0x114   :  { %v891_v1 = vadd.f32 %v887_v0, %v820_v63  ;;  %v3545_v3 = vpop.f32.mrb[19].mxu1  ;;  %v1223_v2 = vld [vmem:[#allocation2 + $0x10] sm:$0xff] }
 0x116   :  { %v3200_v5 = vmul.f32 -1.442695, %v891_v1 }
 0x118   :  { %4057 = vpow2.f32 %v3200_v5 }
 0x119   :  { %v4054_v7 = vpop.eup %4053  ;;  %4059 = vtanh.f32 %v818_v6 }
 0x11a   :  { %v4056_v8 = vpop.eup %4055  ;;  %v666_v9 = vadd.f32 1.0, %v4054_v7 }
 0x11b   :  { %v744_v10 = vadd.f32 1.0, %v4056_v8 }
 0x11c   :  { %4061 = vrcp.f32 %v666_v9 }
 0x11d   :  { %4063 = vrcp.f32 %v744_v10 }
 0x122   :  { %v4058_v12 = vpop.eup %4057 }
 0x123   :  { %v4060_v13 = vpop.eup %4059  ;;  %v895_v19 = vadd.f32 1.0, %v4058_v12 }
 0x125   :  { %4065 = vrcp.f32 %v895_v19 }
 0x126   :  { %v4062_v14 = vpop.eup %4061 }
 0x127   :  { %v4064_v15 = vpop.eup %4063  ;;  %v899_v16 = vmul.f32 %v4062_v14, %v4060_v13  ;;  %v1458_v14 = vld [vmem:[#allocation5 + $0x10] sm:$0xff] }
 0x128   :  { %v898_v20 = vmul.f32 0.0, %v4064_v15 }
 0x12a   :  { %v4451_v21 = vadd.f32 %v899_v16, %v898_v20 }
 0x12c   :  { %4067 = vtanh.f32 %v4451_v21 }
 0x12f   :  { %v4066_v22 = vpop.eup %4065 }
 0x136   :  { %v4068_v25 = vpop.eup %4067 }
 0x137   :  { %v902_v26 = vmul.f32 %v4068_v25, %v4066_v22 }
 0x139   :  { %3555 = vmatmul.mubr.msk.f32.vlgmr.msra.gmra.mrb[20].mxu0 %vm182_vm3, %v902_v26  ;;  %3566 = vmatmul.mubr.msk.f32.vlgmr.msra.gmra.mrb[20].mxu1 %vm182_vm3, %v902_v26 }
 0x13a   :  { %3892 = vmatpush3.bf16.msra.mxu0 %v4371_v30  ;;  %3898 = vmatpush3.bf16.msra.mxu1 %v4373_v31 }
 0x13b   :  { %3893 = vmatprep.subr.bf16.mxu0 %v4232_v11  ;;  %3899 = vmatprep.subr.bf16.mxu1 %v4232_v11 }
 0x13c   :  { %3576 = vmatprep.mubr.msk.f32.mxu0 %vm4233_vm2, %v4234_v29  ;;  %3587 = vmatprep.mubr.msk.f32.mxu1 %vm4233_vm2, %v4234_v29 }
 0x13e   :  { %3895 = vmatpush3.bf16.msra.mxu0 %v4379_v36  ;;  %3901 = vmatpush3.bf16.msra.mxu1 %v4381_v37 }
 0x13f   :  { %3902 = vmatprep.subr.bf16.mxu0 %v4232_v11  ;;  %3908 = vmatprep.subr.bf16.mxu1 %v4232_v11 }
 0x141   :  { %3577 = vmatmul.mubr.msk.f32.vlgmr.msra.gmra.mrb[22].mxu0 %vm182_vm3, %v902_v26  ;;  %3588 = vmatmul.mubr.msk.f32.vlgmr.msra.gmra.mrb[22].mxu1 %vm182_vm3, %v902_v26 }
 0x142   :  { %3904 = vmatpush3.bf16.msra.mxu0 %v4337_v17  ;;  %3910 = vmatpush3.bf16.msra.mxu1 %v4339_v18 }
 0x143   :  { %3905 = vmatprep.subr.bf16.mxu0 %v4232_v11  ;;  %3911 = vmatprep.subr.bf16.mxu1 %v4232_v11 }
 0x144   :  { %3598 = vmatprep.mubr.msk.f32.mxu0 %vm4233_vm2, %v4234_v29  ;;  %3609 = vmatprep.mubr.msk.f32.mxu1 %vm4233_vm2, %v4234_v29 }
 0x146   :  { %3907 = vmatpush3.bf16.msra.mxu0 %v4347_v23  ;;  %3913 = vmatpush3.bf16.msra.mxu1 %v4349_v24 }
 0x147   :  { %3914 = vmatprep.subr.bf16.mxu0 %v4232_v11  ;;  %3920 = vmatprep.subr.bf16.mxu1 %v4232_v11 }
 0x20c   :  { %v974_v28 = vpop.f32.mrb[20].mxu0  ;;  %v1053_v33 = vpop.f32.mrb[20].mxu1 }
 0x20d   :  { %v978_v34 = vadd.f32 %v974_v28, %v904_v27  ;;  %v1057_v35 = vadd.f32 %v1053_v33, %v986_v32  ;;  %v3556_v38 = vpop.f32.mrb[21].mxu0  ;;  %v3567_v39 = vpop.f32.mrb[21].mxu1 }
 0x20f   :  { %v3202_v40 = vmul.f32 -1.442695, %v978_v34  ;;  %v3204_v41 = vmul.f32 -1.442695, %v1057_v35 }
 0x211   :  { %4069 = vpow2.f32 %v3202_v40 }
 0x212   :  { %4071 = vpow2.f32 %v3204_v41 }
 0x214   :  { %v1132_v42 = vpop.f32.mrb[22].mxu0  ;;  %v1206_v44 = vpop.f32.mrb[22].mxu1 }
 0x215   :  { %v1210_v45 = vadd.f32 %v1206_v44, %v1139_v43  ;;  %v3578_v46 = vpop.f32.mrb[23].mxu0  ;;  %v3589_v47 = vpop.f32.mrb[23].mxu1  ;;  %v1136_v50 = vadd.f32 %v1132_v42, %v1065_v48  ;;  %v1624_v48 = vld [vmem:[#allocation3 + $0x18] sm:$0xff] }
 0x216   :  { %v1542_v46 = vld [vmem:[#allocation2 + $0x18] sm:$0xff] }
 0x217   :  { %v3207_v49 = vmul.f32 -1.442695, %v1210_v45 }
 0x219   :  { %4073 = vpow2.f32 %v3207_v49 }
 0x21a   :  { %4075 = vtanh.f32 %v1136_v50 }
 0x21b   :  { %v4070_v51 = vpop.eup %4069 }
 0x21c   :  { %v4072_v52 = vpop.eup %4071  ;;  %v982_v53 = vadd.f32 1.0, %v4070_v51 }
 0x21d   :  { %v1061_v54 = vadd.f32 1.0, %v4072_v52 }
 0x21e   :  { %4077 = vrcp.f32 %v982_v53 }
 0x21f   :  { %4079 = vrcp.f32 %v1061_v54 }
 0x223   :  { %v4074_v55 = vpop.eup %4073 }
 0x224   :  { %v4076_v56 = vpop.eup %4075  ;;  %v1214_v60 = vadd.f32 1.0, %v4074_v55 }
 0x226   :  { %4081 = vrcp.f32 %v1214_v60 }
 0x228   :  { %v4078_v57 = vpop.eup %4077 }
 0x229   :  { %v4080_v58 = vpop.eup %4079  ;;  %v1218_v59 = vmul.f32 %v4078_v57, %v4076_v56  ;;  %v1777_v57 = vld [vmem:[#allocation5 + $0x18] sm:$0xff] }
 0x22a   :  { %v1217_v61 = vmul.f32 %v4080_v58, %v4451_v21  ;;  %v1384_v21 = vld [vmem:[#allocation4 + $0x10] sm:$0xff] }
 0x22c   :  { %v4483_v62 = vadd.f32 %v1218_v59, %v1217_v61 }
 0x22e   :  { %4083 = vtanh.f32 %v4483_v62 }
 0x230   :  { %v4082_v63 = vpop.eup %4081 }
 0x238   :  { %v4084_v0 = vpop.eup %4083 }
 0x239   :  { %v1221_v1 = vmul.f32 %v4084_v0, %v4082_v63 }
 0x23b   :  { %3599 = vmatmul.mubr.msk.f32.vlgmr.msra.gmra.mrb[24].mxu0 %vm182_vm3, %v1221_v1  ;;  %3610 = vmatmul.mubr.msk.f32.vlgmr.msra.gmra.mrb[24].mxu1 %vm182_vm3, %v1221_v1 }
 0x23c   :  { %3916 = vmatpush3.bf16.msra.mxu0 %v4371_v30  ;;  %3922 = vmatpush3.bf16.msra.mxu1 %v4373_v31 }
 0x23d   :  { %3917 = vmatprep.subr.bf16.mxu0 %v4232_v11  ;;  %3923 = vmatprep.subr.bf16.mxu1 %v4232_v11 }
 0x23e   :  { %3620 = vmatprep.mubr.msk.f32.mxu0 %vm4233_vm2, %v4234_v29  ;;  %3631 = vmatprep.mubr.msk.f32.mxu1 %vm4233_vm2, %v4234_v29 }
 0x240   :  { %3919 = vmatpush3.bf16.msra.mxu0 %v4379_v36  ;;  %3925 = vmatpush3.bf16.msra.mxu1 %v4381_v37 }
 0x241   :  { %3926 = vmatprep.subr.bf16.mxu0 %v4232_v11  ;;  %3932 = vmatprep.subr.bf16.mxu1 %v4232_v11 }
 0x243   :  { %3621 = vmatmul.mubr.msk.f32.vlgmr.msra.gmra.mrb[26].mxu0 %vm182_vm3, %v1221_v1  ;;  %3632 = vmatmul.mubr.msk.f32.vlgmr.msra.gmra.mrb[26].mxu1 %vm182_vm3, %v1221_v1 }
 0x244   :  { %3928 = vmatpush3.bf16.msra.mxu0 %v4337_v17  ;;  %3934 = vmatpush3.bf16.msra.mxu1 %v4339_v18 }
 0x245   :  { %3929 = vmatprep.subr.bf16.mxu0 %v4232_v11  ;;  %3935 = vmatprep.subr.bf16.mxu1 %v4232_v11 }
 0x246   :  { %3642 = vmatprep.mubr.msk.f32.mxu0 %vm4233_vm2, %v4234_v29  ;;  %3653 = vmatprep.mubr.msk.f32.mxu1 %vm4233_vm2, %v4234_v29 }
 0x248   :  { %3931 = vmatpush3.bf16.msra.mxu0 %v4347_v23  ;;  %3937 = vmatpush3.bf16.msra.mxu1 %v4349_v24 }
 0x249   :  { %3938 = vmatprep.subr.bf16.mxu0 %v4232_v11  ;;  %3944 = vmatprep.subr.bf16.mxu1 %v4232_v11 }
 0x30e   :  { %v1293_v3 = vpop.f32.mrb[24].mxu0  ;;  %v1372_v5 = vpop.f32.mrb[24].mxu1 }
 0x30f   :  { %v1297_v6 = vadd.f32 %v1293_v3, %v1223_v2  ;;  %v1376_v7 = vadd.f32 %v1372_v5, %v1305_v4  ;;  %v3600_v8 = vpop.f32.mrb[25].mxu0  ;;  %v3611_v9 = vpop.f32.mrb[25].mxu1 }
 0x311   :  { %v3209_v10 = vmul.f32 -1.442695, %v1297_v6  ;;  %v3211_v12 = vmul.f32 -1.442695, %v1376_v7 }
 0x313   :  { %4085 = vpow2.f32 %v3209_v10 }
 0x314   :  { %4087 = vpow2.f32 %v3211_v12 }
 0x316   :  { %v1451_v13 = vpop.f32.mrb[26].mxu0  ;;  %v1525_v15 = vpop.f32.mrb[26].mxu1 }
 0x317   :  { %v1529_v16 = vadd.f32 %v1525_v15, %v1458_v14  ;;  %v3622_v19 = vpop.f32.mrb[27].mxu0  ;;  %v3633_v20 = vpop.f32.mrb[27].mxu1  ;;  %v1455_v25 = vadd.f32 %v1451_v13, %v1384_v21  ;;  %v1943_v21 = vld [vmem:[#allocation3 + $0x20] sm:$0xff] }
 0x318   :  { %v1861_v19 = vld [vmem:[#allocation2 + $0x20] sm:$0xff] }
 0x319   :  { %v3214_v22 = vmul.f32 -1.442695, %v1529_v16 }
 0x31b   :  { %4089 = vpow2.f32 %v3214_v22 }
 0x31c   :  { %4091 = vtanh.f32 %v1455_v25 }
 0x31d   :  { %v4086_v26 = vpop.eup %4085 }
 0x31e   :  { %v4088_v27 = vpop.eup %4087  ;;  %v1301_v28 = vadd.f32 1.0, %v4086_v26 }
 0x31f   :  { %v1380_v32 = vadd.f32 1.0, %v4088_v27 }
 0x320   :  { %4093 = vrcp.f32 %v1301_v28 }
 0x321   :  { %4095 = vrcp.f32 %v1380_v32 }
 0x325   :  { %v4090_v33 = vpop.eup %4089 }
 0x326   :  { %v4092_v34 = vpop.eup %4091  ;;  %v1533_v40 = vadd.f32 1.0, %v4090_v33 }
 0x328   :  { %4097 = vrcp.f32 %v1533_v40 }
 0x32a   :  { %v4094_v35 = vpop.eup %4093 }
 0x32b   :  { %v4096_v38 = vpop.eup %4095  ;;  %v1537_v39 = vmul.f32 %v4094_v35, %v4092_v34  ;;  %v2096_v35 = vld [vmem:[#allocation5 + $0x20] sm:$0xff] }
 0x32c   :  { %v1536_v41 = vmul.f32 %v4096_v38, %v4483_v62  ;;  %v1703_v62 = vld [vmem:[#allocation4 + $0x18] sm:$0xff] }
 0x32e   :  { %v4515_v42 = vadd.f32 %v1537_v39, %v1536_v41 }
 0x330   :  { %4099 = vtanh.f32 %v4515_v42 }
 0x332   :  { %v4098_v43 = vpop.eup %4097 }
 0x33a   :  { %v4100_v44 = vpop.eup %4099 }
 0x33b   :  { %v1540_v45 = vmul.f32 %v4100_v44, %v4098_v43 }
 0x33d   :  { %3643 = vmatmul.mubr.msk.f32.vlgmr.msra.gmra.mrb[28].mxu0 %vm182_vm3, %v1540_v45  ;;  %3654 = vmatmul.mubr.msk.f32.vlgmr.msra.gmra.mrb[28].mxu1 %vm182_vm3, %v1540_v45 }
 0x33e   :  { %3940 = vmatpush3.bf16.msra.mxu0 %v4371_v30  ;;  %3946 = vmatpush3.bf16.msra.mxu1 %v4373_v31 }
 0x33f   :  { %3941 = vmatprep.subr.bf16.mxu0 %v4232_v11  ;;  %3947 = vmatprep.subr.bf16.mxu1 %v4232_v11 }
 0x340   :  { %3664 = vmatprep.mubr.msk.f32.mxu0 %vm4233_vm2, %v4234_v29  ;;  %3675 = vmatprep.mubr.msk.f32.mxu1 %vm4233_vm2, %v4234_v29 }
 0x342   :  { %3943 = vmatpush3.bf16.msra.mxu0 %v4379_v36  ;;  %3949 = vmatpush3.bf16.msra.mxu1 %v4381_v37 }
 0x343   :  { %3950 = vmatprep.subr.bf16.mxu0 %v4232_v11  ;;  %3956 = vmatprep.subr.bf16.mxu1 %v4232_v11 }
 0x345   :  { %3665 = vmatmul.mubr.msk.f32.vlgmr.msra.gmra.mrb[30].mxu0 %vm182_vm3, %v1540_v45  ;;  %3676 = vmatmul.mubr.msk.f32.vlgmr.msra.gmra.mrb[30].mxu1 %vm182_vm3, %v1540_v45 }
 0x346   :  { %3952 = vmatpush3.bf16.msra.mxu0 %v4337_v17  ;;  %3958 = vmatpush3.bf16.msra.mxu1 %v4339_v18 }
 0x347   :  { %3953 = vmatprep.subr.bf16.mxu0 %v4232_v11  ;;  %3959 = vmatprep.subr.bf16.mxu1 %v4232_v11 }
 0x348   :  { %3686 = vmatprep.mubr.msk.f32.mxu0 %vm4233_vm2, %v4234_v29  ;;  %3697 = vmatprep.mubr.msk.f32.mxu1 %vm4233_vm2, %v4234_v29 }
 0x34a   :  { %3955 = vmatpush3.bf16.msra.mxu0 %v4347_v23  ;;  %3961 = vmatpush3.bf16.msra.mxu1 %v4349_v24 }
 0x34b   :  { %3962 = vmatprep.subr.bf16.mxu0 %v4232_v11  ;;  %3968 = vmatprep.subr.bf16.mxu1 %v4232_v11 }
 0x410   :  { %v1612_v47 = vpop.f32.mrb[28].mxu0  ;;  %v1691_v49 = vpop.f32.mrb[28].mxu1 }
 0x411   :  { %v1616_v50 = vadd.f32 %v1612_v47, %v1542_v46  ;;  %v1695_v51 = vadd.f32 %v1691_v49, %v1624_v48  ;;  %v3644_v52 = vpop.f32.mrb[29].mxu0  ;;  %v3655_v53 = vpop.f32.mrb[29].mxu1 }
 0x413   :  { %v3216_v54 = vmul.f32 -1.442695, %v1616_v50  ;;  %v3218_v55 = vmul.f32 -1.442695, %v1695_v51 }
 0x415   :  { %4101 = vpow2.f32 %v3216_v54 }
 0x416   :  { %4103 = vpow2.f32 %v3218_v55 }
 0x418   :  { %v1770_v56 = vpop.f32.mrb[30].mxu0  ;;  %v1844_v58 = vpop.f32.mrb[30].mxu1 }
 0x419   :  { %v1848_v59 = vadd.f32 %v1844_v58, %v1777_v57  ;;  %v3666_v60 = vpop.f32.mrb[31].mxu0  ;;  %v3677_v61 = vpop.f32.mrb[31].mxu1  ;;  %v1774_v0 = vadd.f32 %v1770_v56, %v1703_v62  ;;  %v2262_v62 = vld [vmem:[#allocation3 + $0x28] sm:$0xff] }
 0x41a   :  { %v2180_v60 = vld [vmem:[#allocation2 + $0x28] sm:$0xff] }
 0x41b   :  { %v3221_v63 = vmul.f32 -1.442695, %v1848_v59 }
 0x41d   :  { %4105 = vpow2.f32 %v3221_v63 }
 0x41e   :  { %4107 = vtanh.f32 %v1774_v0 }
 0x41f   :  { %v4102_v1 = vpop.eup %4101 }
 0x420   :  { %v4104_v2 = vpop.eup %4103  ;;  %v1620_v3 = vadd.f32 1.0, %v4102_v1 }
 0x421   :  { %v1699_v4 = vadd.f32 1.0, %v4104_v2 }
 0x422   :  { %4109 = vrcp.f32 %v1620_v3 }
 0x423   :  { %4111 = vrcp.f32 %v1699_v4 }
 0x427   :  { %v4106_v5 = vpop.eup %4105 }
 0x428   :  { %v4108_v6 = vpop.eup %4107  ;;  %v1852_v10 = vadd.f32 1.0, %v4106_v5 }
 0x42a   :  { %4113 = vrcp.f32 %v1852_v10 }
 0x42c   :  { %v4110_v7 = vpop.eup %4109 }
 0x42d   :  { %v4112_v8 = vpop.eup %4111  ;;  %v1856_v9 = vmul.f32 %v4110_v7, %v4108_v6  ;;  %v2415_v7 = vld [vmem:[#allocation5 + $0x28] sm:$0xff] }
 0x42e   :  { %v1855_v12 = vmul.f32 %v4112_v8, %v4515_v42  ;;  %v2022_v42 = vld [vmem:[#allocation4 + $0x20] sm:$0xff] }
 0x430   :  { %v4547_v13 = vadd.f32 %v1856_v9, %v1855_v12 }
 0x432   :  { %4115 = vtanh.f32 %v4547_v13 }
 0x434   :  { %v4114_v14 = vpop.eup %4113 }
 0x43c   :  { %v4116_v15 = vpop.eup %4115 }
 0x43d   :  { %v1859_v16 = vmul.f32 %v4116_v15, %v4114_v14 }
 0x43f   :  { %3687 = vmatmul.mubr.msk.f32.vlgmr.msra.gmra.mrb[32].mxu0 %vm182_vm3, %v1859_v16  ;;  %3698 = vmatmul.mubr.msk.f32.vlgmr.msra.gmra.mrb[32].mxu1 %vm182_vm3, %v1859_v16 }
 0x440   :  { %3964 = vmatpush3.bf16.msra.mxu0 %v4371_v30  ;;  %3970 = vmatpush3.bf16.msra.mxu1 %v4373_v31 }
 0x441   :  { %3965 = vmatprep.subr.bf16.mxu0 %v4232_v11  ;;  %3971 = vmatprep.subr.bf16.mxu1 %v4232_v11 }
 0x442   :  { %3708 = vmatprep.mubr.msk.f32.mxu0 %vm4233_vm2, %v4234_v29  ;;  %3719 = vmatprep.mubr.msk.f32.mxu1 %vm4233_vm2, %v4234_v29 }
 0x444   :  { %3967 = vmatpush3.bf16.msra.mxu0 %v4379_v36  ;;  %3973 = vmatpush3.bf16.msra.mxu1 %v4381_v37 }
 0x445   :  { %3974 = vmatprep.subr.bf16.mxu0 %v4232_v11  ;;  %3980 = vmatprep.subr.bf16.mxu1 %v4232_v11 }
 0x447   :  { %3709 = vmatmul.mubr.msk.f32.vlgmr.msra.gmra.mrb[34].mxu0 %vm182_vm3, %v1859_v16  ;;  %3720 = vmatmul.mubr.msk.f32.vlgmr.msra.gmra.mrb[34].mxu1 %vm182_vm3, %v1859_v16 }
 0x448   :  { %3976 = vmatpush3.bf16.msra.mxu0 %v4337_v17  ;;  %3982 = vmatpush3.bf16.msra.mxu1 %v4339_v18 }
 0x449   :  { %3977 = vmatprep.subr.bf16.mxu0 %v4232_v11  ;;  %3983 = vmatprep.subr.bf16.mxu1 %v4232_v11 }
 0x44a   :  { %3730 = vmatprep.mubr.msk.f32.mxu0 %vm4233_vm2, %v4234_v29  ;;  %3741 = vmatprep.mubr.msk.f32.mxu1 %vm4233_vm2, %v4234_v29 }
 0x44c   :  { %3979 = vmatpush3.bf16.msra.mxu0 %v4347_v23  ;;  %3985 = vmatpush3.bf16.msra.mxu1 %v4349_v24 }
 0x44d   :  { %3986 = vmatprep.subr.bf16.mxu0 %v4232_v11  ;;  %3992 = vmatprep.subr.bf16.mxu1 %v4232_v11 }
 0x512   :  { %v1931_v20 = vpop.f32.mrb[32].mxu0  ;;  %v2010_v22 = vpop.f32.mrb[32].mxu1 }
 0x513   :  { %v1935_v25 = vadd.f32 %v1931_v20, %v1861_v19  ;;  %v2014_v26 = vadd.f32 %v2010_v22, %v1943_v21  ;;  %v3688_v27 = vpop.f32.mrb[33].mxu0  ;;  %v3699_v28 = vpop.f32.mrb[33].mxu1 }
 0x515   :  { %v3223_v32 = vmul.f32 -1.442695, %v1935_v25  ;;  %v3225_v33 = vmul.f32 -1.442695, %v2014_v26 }
 0x517   :  { %4117 = vpow2.f32 %v3223_v32 }
 0x518   :  { %4119 = vpow2.f32 %v3225_v33 }
 0x51a   :  { %v2089_v34 = vpop.f32.mrb[34].mxu0  ;;  %v2163_v38 = vpop.f32.mrb[34].mxu1 }
 0x51b   :  { %v2167_v39 = vadd.f32 %v2163_v38, %v2096_v35  ;;  %v3710_v40 = vpop.f32.mrb[35].mxu0  ;;  %v3721_v41 = vpop.f32.mrb[35].mxu1  ;;  %v2093_v44 = vadd.f32 %v2089_v34, %v2022_v42 }
 0x51c   :  { %v2581_v40 = vld [vmem:[#allocation3 + $0x30] sm:$0xff] }
 0x51d   :  { %v3228_v43 = vmul.f32 -1.442695, %v2167_v39 }
 0x51f   :  { %4121 = vpow2.f32 %v3228_v43 }
 0x520   :  { %4123 = vtanh.f32 %v2093_v44 }
 0x521   :  { %v4118_v45 = vpop.eup %4117 }
 0x522   :  { %v4120_v46 = vpop.eup %4119  ;;  %v1939_v47 = vadd.f32 1.0, %v4118_v45 }
 0x523   :  { %v2018_v48 = vadd.f32 1.0, %v4120_v46 }
 0x524   :  { %4125 = vrcp.f32 %v1939_v47 }
 0x525   :  { %4127 = vrcp.f32 %v2018_v48 }
 0x529   :  { %v4122_v49 = vpop.eup %4121 }
 0x52a   :  { %v4124_v50 = vpop.eup %4123  ;;  %v2171_v54 = vadd.f32 1.0, %v4122_v49 }
 0x52c   :  { %4129 = vrcp.f32 %v2171_v54 }
 0x52e   :  { %v4126_v51 = vpop.eup %4125 }
 0x52f   :  { %v4128_v52 = vpop.eup %4127  ;;  %v2175_v53 = vmul.f32 %v4126_v51, %v4124_v50 }
 0x530   :  { %v2174_v55 = vmul.f32 %v4128_v52, %v4547_v13  ;;  %v2341_v13 = vld [vmem:[#allocation4 + $0x28] sm:$0xff]  ;;  %v2660_v52 = vld [vmem:[#allocation4 + $0x30] sm:$0xff] }
 0x532   :  { %v4579_v56 = vadd.f32 %v2175_v53, %v2174_v55 }
 0x534   :  { %4131 = vtanh.f32 %v4579_v56 }
 0x536   :  { %v4130_v57 = vpop.eup %4129 }
 0x53e   :  { %v4132_v58 = vpop.eup %4131 }
 0x53f   :  { %v2178_v59 = vmul.f32 %v4132_v58, %v4130_v57 }
 0x541   :  { %3731 = vmatmul.mubr.msk.f32.vlgmr.msra.gmra.mrb[36].mxu0 %vm182_vm3, %v2178_v59  ;;  %3742 = vmatmul.mubr.msk.f32.vlgmr.msra.gmra.mrb[36].mxu1 %vm182_vm3, %v2178_v59 }
 0x542   :  { %3988 = vmatpush3.bf16.msra.mxu0 %v4371_v30  ;;  %3994 = vmatpush3.bf16.msra.mxu1 %v4373_v31 }
 0x543   :  { %3989 = vmatprep.subr.bf16.mxu0 %v4232_v11  ;;  %3995 = vmatprep.subr.bf16.mxu1 %v4232_v11 }
 0x544   :  { %3752 = vmatprep.mubr.msk.f32.mxu0 %vm4233_vm2, %v4234_v29  ;;  %3763 = vmatprep.mubr.msk.f32.mxu1 %vm4233_vm2, %v4234_v29 }
 0x546   :  { %3991 = vmatpush3.bf16.msra.mxu0 %v4379_v36  ;;  %3997 = vmatpush3.bf16.msra.mxu1 %v4381_v37 }
 0x547   :  { %3998 = vmatprep.subr.bf16.mxu0 %v4232_v11  ;;  %4004 = vmatprep.subr.bf16.mxu1 %v4232_v11 }
 0x549   :  { %3753 = vmatmul.mubr.msk.f32.vlgmr.msra.gmra.mrb[38].mxu0 %vm182_vm3, %v2178_v59  ;;  %3764 = vmatmul.mubr.msk.f32.vlgmr.msra.gmra.mrb[38].mxu1 %vm182_vm3, %v2178_v59 }
 0x54a   :  { %4000 = vmatpush3.bf16.msra.mxu0 %v4337_v17  ;;  %4006 = vmatpush3.bf16.msra.mxu1 %v4339_v18 }
 0x54b   :  { %4001 = vmatprep.subr.bf16.mxu0 %v4232_v11  ;;  %4007 = vmatprep.subr.bf16.mxu1 %v4232_v11 }
 0x54c   :  { %3774 = vmatprep.mubr.msk.f32.mxu0 %vm4233_vm2, %v4234_v29  ;;  %3785 = vmatprep.mubr.msk.f32.mxu1 %vm4233_vm2, %v4234_v29 }
 0x54e   :  { %4003 = vmatpush3.bf16.msra.mxu0 %v4347_v23  ;;  %4009 = vmatpush3.bf16.msra.mxu1 %v4349_v24 }
 0x54f   :  { %4010 = vmatprep.subr.bf16.mxu0 %v4232_v11  ;;  %4016 = vmatprep.subr.bf16.mxu1 %v4232_v11 }
 0x614   :  { %v2250_v61 = vpop.f32.mrb[36].mxu0  ;;  %v2329_v63 = vpop.f32.mrb[36].mxu1 }
 0x615   :  { %v2254_v0 = vadd.f32 %v2250_v61, %v2180_v60  ;;  %v2333_v1 = vadd.f32 %v2329_v63, %v2262_v62  ;;  %v3732_v2 = vpop.f32.mrb[37].mxu0  ;;  %v3743_v3 = vpop.f32.mrb[37].mxu1 }
 0x617   :  { %v3230_v4 = vmul.f32 -1.442695, %v2254_v0  ;;  %v3232_v5 = vmul.f32 -1.442695, %v2333_v1 }
 0x619   :  { %4133 = vpow2.f32 %v3230_v4 }
 0x61a   :  { %4135 = vpow2.f32 %v3232_v5 }
 0x61c   :  { %v2408_v6 = vpop.f32.mrb[38].mxu0  ;;  %v2482_v8 = vpop.f32.mrb[38].mxu1 }
 0x61d   :  { %v2486_v9 = vadd.f32 %v2482_v8, %v2415_v7  ;;  %v3754_v10 = vpop.f32.mrb[39].mxu0  ;;  %v3765_v12 = vpop.f32.mrb[39].mxu1  ;;  %v2412_v15 = vadd.f32 %v2408_v6, %v2341_v13  ;;  %v2900_v6 = vld [vmem:[#allocation3 + $0x38] sm:$0xff] }
 0x61f   :  { %v3235_v14 = vmul.f32 -1.442695, %v2486_v9 }
 0x621   :  { %4137 = vpow2.f32 %v3235_v14 }
 0x622   :  { %4139 = vtanh.f32 %v2412_v15 }
 0x623   :  { %v4134_v16 = vpop.eup %4133 }
 0x624   :  { %v4136_v19 = vpop.eup %4135  ;;  %v2258_v20 = vadd.f32 1.0, %v4134_v16 }
 0x625   :  { %v2337_v21 = vadd.f32 1.0, %v4136_v19  ;;  %v2979_v19 = vld [vmem:[#allocation4 + $0x38] sm:$0xff] }
 0x626   :  { %4141 = vrcp.f32 %v2258_v20 }
 0x627   :  { %4143 = vrcp.f32 %v2337_v21 }
 0x62b   :  { %v4138_v22 = vpop.eup %4137 }
 0x62c   :  { %v4140_v25 = vpop.eup %4139  ;;  %v2490_v32 = vadd.f32 1.0, %v4138_v22 }
 0x62e   :  { %4145 = vrcp.f32 %v2490_v32 }
 0x630   :  { %v4142_v26 = vpop.eup %4141 }
 0x631   :  { %v4144_v27 = vpop.eup %4143  ;;  %v2494_v28 = vmul.f32 %v4142_v26, %v4140_v25 }
 0x632   :  { %v2493_v33 = vmul.f32 %v4144_v27, %v4579_v56 }
 0x634   :  { %v4611_v34 = vadd.f32 %v2494_v28, %v2493_v33 }
 0x636   :  { %4147 = vtanh.f32 %v4611_v34 }
 0x638   :  { %v4146_v35 = vpop.eup %4145 }
 0x640   :  { %v4148_v38 = vpop.eup %4147 }
 0x641   :  { %v2497_v39 = vmul.f32 %v4148_v38, %v4146_v35 }
 0x643   :  { %3775 = vmatmul.mubr.msk.f32.vlgmr.msra.gmra.mrb[40].mxu0 %vm182_vm3, %v2497_v39  ;;  %3786 = vmatmul.mubr.msk.f32.vlgmr.msra.gmra.mrb[40].mxu1 %vm182_vm3, %v2497_v39 }
 0x644   :  { %4012 = vmatpush3.bf16.msra.mxu0 %v4371_v30  ;;  %4018 = vmatpush3.bf16.msra.mxu1 %v4373_v31 }
 0x645   :  { %4013 = vmatprep.subr.bf16.mxu0 %v4232_v11  ;;  %4019 = vmatprep.subr.bf16.mxu1 %v4232_v11 }
 0x646   :  { %3796 = vmatprep.mubr.msk.f32.mxu0 %vm4233_vm2, %v4234_v29  ;;  %3807 = vmatprep.mubr.msk.f32.mxu1 %vm4233_vm2, %v4234_v29 }
 0x648   :  { %4015 = vmatpush3.bf16.msra.mxu0 %v4379_v36  ;;  %4021 = vmatpush3.bf16.msra.mxu1 %v4381_v37 }
 0x649   :  { %4022 = vmatprep.subr.bf16.mxu0 %v4232_v11  ;;  %4028 = vmatprep.subr.bf16.mxu1 %v4232_v11 }
 0x64b   :  { %3797 = vmatmul.mubr.msk.f32.vlgmr.msra.gmra.mrb[42].mxu0 %vm182_vm3, %v2497_v39  ;;  %3808 = vmatmul.mubr.msk.f32.vlgmr.msra.gmra.mrb[42].mxu1 %vm182_vm3, %v2497_v39 }
 0x64c   :  { %4024 = vmatpush3.bf16.msra.mxu0 %v4337_v17  ;;  %4030 = vmatpush3.bf16.msra.mxu1 %v4339_v18  ;;  %v2499_v17 = vld [vmem:[#allocation2 + $0x30] sm:$0xff] }
 0x64d   :  { %4025 = vmatprep.subr.bf16.mxu0 %v4232_v11  ;;  %4031 = vmatprep.subr.bf16.mxu1 %v4232_v11 }
 0x64e   :  { %3818 = vmatprep.mubr.msk.f32.mxu0 %vm4233_vm2, %v4234_v29  ;;  %3829 = vmatprep.mubr.msk.f32.mxu1 %vm4233_vm2, %v4234_v29 }
 0x650   :  { %4027 = vmatpush3.bf16.msra.mxu0 %v4347_v23  ;;  %4033 = vmatpush3.bf16.msra.mxu1 %v4349_v24  ;;  %v2734_v23 = vld [vmem:[#allocation5 + $0x30] sm:$0xff] }
 0x651   :  { %4034 = vmatprep.subr.bf16.mxu0 %v4232_v11  ;;  %4040 = vmatprep.subr.bf16.mxu1 %v4232_v11 }
 0x716   :  { %v2569_v18 = vpop.f32.mrb[40].mxu0  ;;  %v2648_v41 = vpop.f32.mrb[40].mxu1 }
 0x717   :  { %v2573_v42 = vadd.f32 %v2569_v18, %v2499_v17  ;;  %v2652_v43 = vadd.f32 %v2648_v41, %v2581_v40  ;;  %v3776_v44 = vpop.f32.mrb[41].mxu0  ;;  %v3787_v45 = vpop.f32.mrb[41].mxu1 }
 0x719   :  { %v3237_v46 = vmul.f32 -1.442695, %v2573_v42  ;;  %v3239_v47 = vmul.f32 -1.442695, %v2652_v43 }
 0x71b   :  { %4149 = vpow2.f32 %v3237_v46 }
 0x71c   :  { %4151 = vpow2.f32 %v3239_v47 }
 0x71e   :  { %v2727_v48 = vpop.f32.mrb[42].mxu0  ;;  %v2801_v49 = vpop.f32.mrb[42].mxu1 }
 0x71f   :  { %v2805_v24 = vadd.f32 %v2801_v49, %v2734_v23  ;;  %v3798_v50 = vpop.f32.mrb[43].mxu0  ;;  %v3809_v51 = vpop.f32.mrb[43].mxu1  ;;  %v2731_v54 = vadd.f32 %v2727_v48, %v2660_v52 }
 0x721   :  { %v3242_v53 = vmul.f32 -1.442695, %v2805_v24 }
 0x723   :  { %4153 = vpow2.f32 %v3242_v53 }
 0x724   :  { %4155 = vtanh.f32 %v2731_v54 }
 0x725   :  { %v4150_v55 = vpop.eup %4149 }
 0x726   :  { %v4152_v56 = vpop.eup %4151  ;;  %v2577_v57 = vadd.f32 1.0, %v4150_v55 }
 0x727   :  { %v2656_v58 = vadd.f32 1.0, %v4152_v56 }
 0x728   :  { %4157 = vrcp.f32 %v2577_v57 }
 0x729   :  { %4159 = vrcp.f32 %v2656_v58 }
 0x72d   :  { %v4154_v59 = vpop.eup %4153 }
 0x72e   :  { %v4156_v60 = vpop.eup %4155  ;;  %v2809_v0 = vadd.f32 1.0, %v4154_v59 }
 0x730   :  { %4161 = vrcp.f32 %v2809_v0 }
 0x732   :  { %v4158_v61 = vpop.eup %4157 }
 0x733   :  { %v4160_v62 = vpop.eup %4159  ;;  %v2813_v63 = vmul.f32 %v4158_v61, %v4156_v60 }
 0x734   :  { %v2812_v1 = vmul.f32 %v4160_v62, %v4611_v34 }
 0x736   :  { %v2814_v2 = vadd.f32 %v2813_v63, %v2812_v1 }
 0x738   :  { %4163 = vtanh.f32 %v2814_v2 }
 0x73a   :  { %v4162_v3 = vpop.eup %4161 }
 0x742   :  { %v4164_v4 = vpop.eup %4163 }
 0x743   :  { %v2816_v5 = vmul.f32 %v4164_v4, %v4162_v3 }
 0x745   :  { %3819 = vmatmul.mubr.msk.f32.vlgmr.msra.gmra.mrb[44].mxu0 %vm182_vm3, %v2816_v5  ;;  %3830 = vmatmul.mubr.msk.f32.vlgmr.msra.gmra.mrb[44].mxu1 %vm182_vm3, %v2816_v5 }
 0x746   :  { %4036 = vmatpush3.bf16.msra.mxu0 %v4371_v30  ;;  %4042 = vmatpush3.bf16.msra.mxu1 %v4373_v31  ;;  %v2818_v30 = vld [vmem:[#allocation2 + $0x38] sm:$0xff] }
 0x747   :  { %4037 = vmatprep.subr.bf16.mxu0 %v4232_v11  ;;  %4043 = vmatprep.subr.bf16.mxu1 %v4232_v11 }
 0x748   :  { %3840 = vmatprep.mubr.msk.f32.mxu0 %vm4233_vm2, %v4234_v29  ;;  %3851 = vmatprep.mubr.msk.f32.mxu1 %vm4233_vm2, %v4234_v29 }
 0x74a   :  { %4039 = vmatpush3.bf16.msra.mxu0 %v4379_v36  ;;  %4045 = vmatpush3.bf16.msra.mxu1 %v4381_v37  ;;  %v3053_v36 = vld [vmem:[#allocation5 + $0x38] sm:$0xff] }
 0x74d   :  { %3841 = vmatmul.mubr.msk.f32.vlgmr.msra.gmra.mrb[46].mxu0 %vm182_vm3, %v2816_v5  ;;  %3852 = vmatmul.mubr.msk.f32.vlgmr.msra.gmra.mrb[46].mxu1 %vm182_vm3, %v2816_v5 }
 0x818   :  { %v2888_v31 = vpop.f32.mrb[44].mxu0  ;;  %v2967_v7 = vpop.f32.mrb[44].mxu1 }
 0x819   :  { %v2892_v8 = vadd.f32 %v2888_v31, %v2818_v30  ;;  %v2971_v11 = vadd.f32 %v2967_v7, %v2900_v6  ;;  %v3820_v9 = vpop.f32.mrb[45].mxu0  ;;  %v3831_v10 = vpop.f32.mrb[45].mxu1 }
 0x81b   :  { %v3244_v12 = vmul.f32 -1.442695, %v2892_v8  ;;  %v3246_v13 = vmul.f32 -1.442695, %v2971_v11 }
 0x81d   :  { %4165 = vpow2.f32 %v3244_v12 }
 0x81e   :  { %4167 = vpow2.f32 %v3246_v13 }
 0x820   :  { %v3046_v29 = vpop.f32.mrb[46].mxu0  ;;  %v3120_v14 = vpop.f32.mrb[46].mxu1 }
 0x821   :  { %v3124_v37 = vadd.f32 %v3120_v14, %v3053_v36  ;;  %v3842_v15 = vpop.f32.mrb[47].mxu0  ;;  %v3853_v16 = vpop.f32.mrb[47].mxu1  ;;  %v3050_v21 = vadd.f32 %v3046_v29, %v2979_v19 }
 0x823   :  { %v3249_v20 = vmul.f32 -1.442695, %v3124_v37 }
 0x825   :  { %4169 = vpow2.f32 %v3249_v20 }
 0x826   :  { %4171 = vtanh.f32 %v3050_v21 }
 0x827   :  { %v4166_v22 = vpop.eup %4165 }
 0x828   :  { %v4168_v25 = vpop.eup %4167  ;;  %v2896_v26 = vadd.f32 1.0, %v4166_v22 }
 0x829   :  { %v2975_v27 = vadd.f32 1.0, %v4168_v25 }
 0x82a   :  { %4173 = vrcp.f32 %v2896_v26 }
 0x82b   :  { %4175 = vrcp.f32 %v2975_v27 }
 0x82f   :  { %v4170_v28 = vpop.eup %4169 }
 0x830   :  { %v4172_v32 = vpop.eup %4171  ;;  %v3128_v38 = vadd.f32 1.0, %v4170_v28 }
 0x832   :  { %4177 = vrcp.f32 %v3128_v38 }
 0x834   :  { %v4174_v33 = vpop.eup %4173 }
 0x835   :  { %v4176_v34 = vpop.eup %4175  ;;  %v3132_v35 = vmul.f32 %v4174_v33, %v4172_v32 }
 0x836   :  { %v3131_v39 = vmul.f32 %v4176_v34, %v2814_v2 }
 0x838   :  { %v3133_v17 = vadd.f32 %v3132_v35, %v3131_v39 }
 0x83a   :  { %4179 = vtanh.f32 %v3133_v17 }
 0x83c   :  { %v4178_v18 = vpop.eup %4177 }
 0x844   :  { %v4180_v40 = vpop.eup %4179 }
 0x845   :  { %v3135_v41 = vmul.f32 %v4180_v40, %v4178_v18 }
 0x847   :  { %3136 = vst.msk [vmem:[#allocation9] sm:$0xff] %vm182_vm3, %v3135_v41 }
 0x848   :  { %4214 = shalt.err (!%p4211_p12)
}
 0x849   :  { %s4215_s9 = scalar_lea.hbm %s4674_s4, 128 }
 0x84a   :  { %p4216_p13 = scmp.ne.s32.totalorder %s4674_s4, %s4215_s9  ;;  %p4219_p0 = scmp.lt.u32.totalorder %s4215_s9, %s4674_s4 }
 0x84c   :  { %p4221_p1 = pnand %p4219_p0, %p4216_p13 }
 0x84e   :  { %4224 = shalt.err (!%p4221_p1)
}
 0x84f   :  { %3146 = dma.vmem_to_hbm [thread:$0]  %s3144_s6, 128, %s4674_s4, [#allocation8]  }
 0x850   :  { %4227 = dma.done.wait [#allocation8], 128  }
 0x851   :  { %4228 = vsyncadd [#allocation8], 4294967168 }
 0x852   :  { %3150 = vsyncpa [#allocation7], 1 }
 0x853   :  { %3151 = vsyncpa [#allocation8], 1 }

</bundles_post_ra>
